<compile_context>
chip_gen: v6e
topology: v6e:2x2x1
jax: 0.10.0
libtpu: 0.0.40
codegen_flags: <defaults>
</compile_context>

<pallas_src>
import functools
import math

import jax
import jax.numpy as jnp
from jax.experimental import pallas as pl
from jax.experimental.pallas import tpu as pltpu


def _decoder_layer_kernel(
    scal_ref,                                   # SMEM (10,) f32: wave amp/phase params
    x_ref, e_ref,                               # (S, D), (Se, D)  (batch dim squeezed)
    wq1_ref, wk1_ref, wv1_ref,                  # (H, D, dh)
    bq1_ref, bk1_ref, bv1_ref,                  # (H, 1, dh)
    wo1_ref, bo1_ref,                           # (H, dh, D), (1, D)
    wq2_ref, wk2_ref, wv2_ref,
    bq2_ref, bk2_ref, bv2_ref,
    wo2_ref, bo2_ref,
    fw1_ref, fb1_ref, fw2_ref, fb2_ref, fw3_ref, fb3_ref,
    o_ref,                                      # (S, D)
    *, n_heads, head_dim, apply_final_act):
  """One full DecoderLayer (2x MHA + WaveActs + FFN + residuals) for one batch row."""

  def wave(v, idx):
    # A * sin(v + phi)  ==  w1*sin(v) + w2*cos(v)   (A, phi precomputed in the wrapper)
    return scal_ref[idx] * jnp.sin(v + scal_ref[idx + 1])

  def mha(q_in, kv_in, wq, wk, wv, bq, bk, bv, wo, bo):
    scale = 1.0 / math.sqrt(head_dim)
    out = None
    for h in range(n_heads):                     # static, tiny head count -> unrolled
      qh = jnp.dot(q_in, wq[h], preferred_element_type=jnp.float32) + bq[h]
      kh = jnp.dot(kv_in, wk[h], preferred_element_type=jnp.float32) + bk[h]
      vh = jnp.dot(kv_in, wv[h], preferred_element_type=jnp.float32) + bv[h]
      # scores = qh @ kh^T  (contract last dims; NT matmul on the MXU)
      s = jax.lax.dot_general(qh, kh, (((1,), (1,)), ((), ())),
                              preferred_element_type=jnp.float32) * scale
      s = s - jnp.max(s, axis=-1, keepdims=True)
      p = jnp.exp(s)
      p = p / jnp.sum(p, axis=-1, keepdims=True)
      ctx = jnp.dot(p, vh, preferred_element_type=jnp.float32)
      # concat over heads followed by out-proj == sum_h ctx_h @ Wo[h]
      head_out = jnp.dot(ctx, wo[h], preferred_element_type=jnp.float32)
      out = head_out if out is None else out + head_out
    return out + bo[...]

  x = x_ref[...].astype(jnp.float32)
  e = e_ref[...].astype(jnp.float32)

  # --- self attention + residual ---
  x = x + mha(x, x, wq1_ref, wk1_ref, wv1_ref, bq1_ref, bk1_ref, bv1_ref,
              wo1_ref, bo1_ref)
  x2 = wave(x, 0)

  # --- cross attention (queries from x2, keys/values from encoder output) + residual ---
  x = x + mha(x2, e, wq2_ref, wk2_ref, wv2_ref, bq2_ref, bk2_ref, bv2_ref,
              wo2_ref, bo2_ref)
  x2 = wave(x, 2)

  # --- feed forward + residual ---
  h = jnp.dot(x2, fw1_ref[...], preferred_element_type=jnp.float32) + fb1_ref[...]
  h = wave(h, 4)
  h = jnp.dot(h, fw2_ref[...], preferred_element_type=jnp.float32) + fb2_ref[...]
  h = wave(h, 6)
  y = jnp.dot(h, fw3_ref[...], preferred_element_type=jnp.float32) + fb3_ref[...]
  x = x + y

  if apply_final_act:   # the Decoder's trailing WaveAct, folded into the last layer
    x = wave(x, 8)

  o_ref[...] = x.astype(o_ref.dtype)


def _amp_phase(w):
  # w1*sin(x) + w2*cos(x) == A*sin(x + phi),  A = sqrt(w1^2+w2^2), phi = atan2(w2, w1)
  return jnp.sqrt(w[0] * w[0] + w[1] * w[1]), jnp.arctan2(w[1], w[0])


def _decoder_layer_pallas(x, e, lp, final_act, n_heads, apply_final_act):
  B, S, D = x.shape
  Se = e.shape[1]
  dh = D // n_heads
  d_ff = lp["ff"]["w1"].shape[1]

  a1, p1 = _amp_phase(lp["act1"])
  a2, p2 = _amp_phase(lp["act2"])
  af1, pf1 = _amp_phase(lp["ff"]["wave1"])
  af2, pf2 = _amp_phase(lp["ff"]["wave2"])
  afin, pfin = _amp_phase(final_act)
  scal = jnp.stack([a1, p1, a2, p2, af1, pf1, af2, pf2, afin, pfin]).astype(jnp.float32)

  kernel = functools.partial(_decoder_layer_kernel, n_heads=n_heads, head_dim=dh,
                             apply_final_act=apply_final_act)
  at1, at2, ff = lp["attn1"], lp["attn2"], lp["ff"]

  c3 = lambda b: (0, 0, 0)   # constant index map -> weight stays VMEM-resident
  c2 = lambda b: (0, 0)

  return pl.pallas_call(
      kernel,
      out_shape=jax.ShapeDtypeStruct((B, S, D), x.dtype),
      grid_spec=pltpu.PrefetchScalarGridSpec(
          num_scalar_prefetch=0,
          grid=(B,),
          in_specs=[
              pl.BlockSpec(memory_space=pltpu.MemorySpace.SMEM),     # wave params
              pl.BlockSpec((None, S, D), lambda b: (b, 0, 0)),       # x (per batch row)
              pl.BlockSpec((None, Se, D), lambda b: (b, 0, 0)),      # e_outputs
              # attn1 (self)
              pl.BlockSpec((n_heads, D, dh), c3),
              pl.BlockSpec((n_heads, D, dh), c3),
              pl.BlockSpec((n_heads, D, dh), c3),
              pl.BlockSpec((n_heads, 1, dh), c3),
              pl.BlockSpec((n_heads, 1, dh), c3),
              pl.BlockSpec((n_heads, 1, dh), c3),
              pl.BlockSpec((n_heads, dh, D), c3),
              pl.BlockSpec((1, D), c2),
              # attn2 (cross)
              pl.BlockSpec((n_heads, D, dh), c3),
              pl.BlockSpec((n_heads, D, dh), c3),
              pl.BlockSpec((n_heads, D, dh), c3),
              pl.BlockSpec((n_heads, 1, dh), c3),
              pl.BlockSpec((n_heads, 1, dh), c3),
              pl.BlockSpec((n_heads, 1, dh), c3),
              pl.BlockSpec((n_heads, dh, D), c3),
              pl.BlockSpec((1, D), c2),
              # feed-forward
              pl.BlockSpec((D, d_ff), c2),
              pl.BlockSpec((1, d_ff), c2),
              pl.BlockSpec((d_ff, d_ff), c2),
              pl.BlockSpec((1, d_ff), c2),
              pl.BlockSpec((d_ff, D), c2),
              pl.BlockSpec((1, D), c2),
          ],
          out_specs=pl.BlockSpec((None, S, D), lambda b: (b, 0, 0)),
      ),
      compiler_params=pltpu.CompilerParams(
          dimension_semantics=("parallel",)),   # batch rows shard across TCs on v7x
  )(scal, x, e,
    at1["wq"], at1["wk"], at1["wv"], at1["bq"], at1["bk"], at1["bv"], at1["wo"], at1["bo"],
    at2["wq"], at2["wk"], at2["wv"], at2["bq"], at2["bk"], at2["bv"], at2["wo"], at2["bo"],
    ff["w1"], ff["b1"], ff["w2"], ff["b2"], ff["w3"], ff["b3"])


def decoder_forward(x, e_outputs, params, n_heads):
  """Decoder.forward: N fused DecoderLayer kernels; final WaveAct folded into the last."""
  n_layers = len(params["layers"])
  for li, lp in enumerate(params["layers"]):
    x = _decoder_layer_pallas(x, e_outputs, lp, params["final_act"], n_heads,
                              apply_final_act=(li == n_layers - 1))
  return x


# ----------------------------- parameters ------------------------------------------


def init_decoder_params(key, d_model, n_layers, n_heads, d_ff=256):
  dh = d_model // n_heads
  keys = jax.random.split(key, n_layers + 1)

  def u(k, shape, bound):
    return jax.random.uniform(k, shape, jnp.float32, -bound, bound)

  def init_attn(k):
    ks = jax.random.split(k, 8)
    bound = 1.0 / math.sqrt(d_model)
    return dict(
        wq=u(ks[0], (n_heads, d_model, dh), bound),   # per-head (in, out) layout
        wk=u(ks[1], (n_heads, d_model, dh), bound),
        wv=u(ks[2], (n_heads, d_model, dh), bound),
        bq=u(ks[3], (n_heads, 1, dh), bound),
        bk=u(ks[4], (n_heads, 1, dh), bound),
        bv=u(ks[5], (n_heads, 1, dh), bound),
        wo=u(ks[6], (n_heads, dh, d_model), bound),
        bo=u(ks[7], (1, d_model), bound))

  def init_ffn(k):
    ks = jax.random.split(k, 8)
    b1, b2 = 1.0 / math.sqrt(d_model), 1.0 / math.sqrt(d_ff)
    return dict(
        w1=u(ks[0], (d_model, d_ff), b1), b1=u(ks[1], (1, d_ff), b1),
        w2=u(ks[2], (d_ff, d_ff), b2),   b2=u(ks[3], (1, d_ff), b2),
        w3=u(ks[4], (d_ff, d_model), b2), b3=u(ks[5], (1, d_model), b2),
        wave1=1.0 + 0.1 * jax.random.normal(ks[6], (2,), jnp.float32),
        wave2=1.0 + 0.1 * jax.random.normal(ks[7], (2,), jnp.float32))

  layers = []
  for li in range(n_layers):
    ks = jax.random.split(keys[li], 5)
    layers.append(dict(
        attn1=init_attn(ks[0]),
        attn2=init_attn(ks[1]),
        act1=1.0 + 0.1 * jax.random.normal(ks[2], (2,), jnp.float32),
        act2=1.0 + 0.1 * jax.random.normal(ks[3], (2,), jnp.float32),
        ff=init_ffn(ks[4])))
  final_act = 1.0 + 0.1 * jax.random.normal(keys[-1], (2,), jnp.float32)
  return dict(layers=layers, final_act=final_act)


# ----------------------------- pure-JAX reference -----------------------------------


def _wave_ref(v, w):
  return w[0] * jnp.sin(v) + w[1] * jnp.cos(v)


def _mha_ref(q_in, kv_in, ap):
  _, _, dh = ap["wq"].shape
  scale = 1.0 / math.sqrt(dh)
  q = jnp.einsum("bsd,hde->bhse", q_in, ap["wq"]) + ap["bq"][None]
  k = jnp.einsum("bsd,hde->bhse", kv_in, ap["wk"]) + ap["bk"][None]
  v = jnp.einsum("bsd,hde->bhse", kv_in, ap["wv"]) + ap["bv"][None]
  s = jnp.einsum("bhqe,bhke->bhqk", q, k) * scale
  p = jax.nn.softmax(s, axis=-1)
  ctx = jnp.einsum("bhqk,bhke->bhqe", p, v)
  return jnp.einsum("bhqe,hed->bqd", ctx, ap["wo"]) + ap["bo"][None]


def _ffn_ref(v, fp):
  h = v @ fp["w1"] + fp["b1"]
  h = _wave_ref(h, fp["wave1"])
  h = h @ fp["w2"] + fp["b2"]
  h = _wave_ref(h, fp["wave2"])
  return h @ fp["w3"] + fp["b3"]


def _decoder_ref(x, e, params):
  for lp in params["layers"]:
    x = x + _mha_ref(x, x, lp["attn1"])
    x2 = _wave_ref(x, lp["act1"])
    x = x + _mha_ref(x2, e, lp["attn2"])
    x2 = _wave_ref(x, lp["act2"])
    x = x + _ffn_ref(x2, lp["ff"])
  return _wave_ref(x, params["final_act"])


# ----------------------------- demo / correctness check ------------------------------

if __name__ == "__main__":
  key = jax.random.PRNGKey(0)
  batch, seq, seq_enc, d_model, n_heads, n_layers, d_ff = 2, 8, 8, 32, 2, 2, 256

  k_x, k_e, k_p = jax.random.split(key, 3)
  x = jax.random.normal(k_x, (batch, seq, d_model), jnp.float32)
  e_outputs = jax.random.normal(k_e, (batch, seq_enc, d_model), jnp.float32)
  params = init_decoder_params(k_p, d_model, n_layers, n_heads, d_ff)

  out = decoder_forward(x, e_outputs, params, n_heads)
  out = jax.block_until_ready(out)

  ref = _decoder_ref(x, e_outputs, params)
  assert out.shape == (batch, seq, d_model)
  assert jnp.allclose(out, ref, atol=1e-3, rtol=1e-3), \
      float(jnp.max(jnp.abs(out - ref)))
  print("KERNEL_OK")
</pallas_src>

<mosaic_0001>
module attributes {stable_mosaic.version = 11 : i64} {
  func.func @_decoder_layer_kernel(%arg0: i32, %arg1: memref<10xf32, #tpu.memory_space<smem>>, %arg2: memref<1x8x32xf32, #tpu.memory_space<vmem>>, %arg3: memref<1x8x32xf32, #tpu.memory_space<vmem>>, %arg4: memref<2x32x16xf32, #tpu.memory_space<vmem>>, %arg5: memref<2x32x16xf32, #tpu.memory_space<vmem>>, %arg6: memref<2x32x16xf32, #tpu.memory_space<vmem>>, %arg7: memref<2x1x16xf32, #tpu.memory_space<vmem>>, %arg8: memref<2x1x16xf32, #tpu.memory_space<vmem>>, %arg9: memref<2x1x16xf32, #tpu.memory_space<vmem>>, %arg10: memref<2x16x32xf32, #tpu.memory_space<vmem>>, %arg11: memref<1x32xf32, #tpu.memory_space<vmem>>, %arg12: memref<2x32x16xf32, #tpu.memory_space<vmem>>, %arg13: memref<2x32x16xf32, #tpu.memory_space<vmem>>, %arg14: memref<2x32x16xf32, #tpu.memory_space<vmem>>, %arg15: memref<2x1x16xf32, #tpu.memory_space<vmem>>, %arg16: memref<2x1x16xf32, #tpu.memory_space<vmem>>, %arg17: memref<2x1x16xf32, #tpu.memory_space<vmem>>, %arg18: memref<2x16x32xf32, #tpu.memory_space<vmem>>, %arg19: memref<1x32xf32, #tpu.memory_space<vmem>>, %arg20: memref<32x256xf32, #tpu.memory_space<vmem>>, %arg21: memref<1x256xf32, #tpu.memory_space<vmem>>, %arg22: memref<256x256xf32, #tpu.memory_space<vmem>>, %arg23: memref<1x256xf32, #tpu.memory_space<vmem>>, %arg24: memref<256x32xf32, #tpu.memory_space<vmem>>, %arg25: memref<1x32xf32, #tpu.memory_space<vmem>>, %arg26: memref<1x8x32xf32, #tpu.memory_space<vmem>>) attributes {dimension_semantics = [#tpu.dimension_semantics<parallel>], iteration_bounds = array<i64: 2>, scalar_prefetch = 0 : i64, scratch_operands = 0 : i64, tpu.core_type = #tpu.core_type<tc>, window_params = [{transform_indices = @transform_0, window_bounds = array<i64: 10>}, {transform_indices = @transform_1, window_bounds = array<i64: 1, 8, 32>}, {transform_indices = @transform_2, window_bounds = array<i64: 1, 8, 32>}, {pipeline_mode = #tpu.pipeline_mode<synchronous>, transform_indices = @transform_3, window_bounds = array<i64: 2, 32, 16>}, {pipeline_mode = #tpu.pipeline_mode<synchronous>, transform_indices = @transform_4, window_bounds = array<i64: 2, 32, 16>}, {pipeline_mode = #tpu.pipeline_mode<synchronous>, transform_indices = @transform_5, window_bounds = array<i64: 2, 32, 16>}, {pipeline_mode = #tpu.pipeline_mode<synchronous>, transform_indices = @transform_6, window_bounds = array<i64: 2, 1, 16>}, {pipeline_mode = #tpu.pipeline_mode<synchronous>, transform_indices = @transform_7, window_bounds = array<i64: 2, 1, 16>}, {pipeline_mode = #tpu.pipeline_mode<synchronous>, transform_indices = @transform_8, window_bounds = array<i64: 2, 1, 16>}, {pipeline_mode = #tpu.pipeline_mode<synchronous>, transform_indices = @transform_9, window_bounds = array<i64: 2, 16, 32>}, {pipeline_mode = #tpu.pipeline_mode<synchronous>, transform_indices = @transform_10, window_bounds = array<i64: 1, 32>}, {pipeline_mode = #tpu.pipeline_mode<synchronous>, transform_indices = @transform_11, window_bounds = array<i64: 2, 32, 16>}, {pipeline_mode = #tpu.pipeline_mode<synchronous>, transform_indices = @transform_12, window_bounds = array<i64: 2, 32, 16>}, {pipeline_mode = #tpu.pipeline_mode<synchronous>, transform_indices = @transform_13, window_bounds = array<i64: 2, 32, 16>}, {pipeline_mode = #tpu.pipeline_mode<synchronous>, transform_indices = @transform_14, window_bounds = array<i64: 2, 1, 16>}, {pipeline_mode = #tpu.pipeline_mode<synchronous>, transform_indices = @transform_15, window_bounds = array<i64: 2, 1, 16>}, {pipeline_mode = #tpu.pipeline_mode<synchronous>, transform_indices = @transform_16, window_bounds = array<i64: 2, 1, 16>}, {pipeline_mode = #tpu.pipeline_mode<synchronous>, transform_indices = @transform_17, window_bounds = array<i64: 2, 16, 32>}, {pipeline_mode = #tpu.pipeline_mode<synchronous>, transform_indices = @transform_18, window_bounds = array<i64: 1, 32>}, {pipeline_mode = #tpu.pipeline_mode<synchronous>, transform_indices = @transform_19, window_bounds = array<i64: 32, 256>}, {pipeline_mode = #tpu.pipeline_mode<synchronous>, transform_indices = @transform_20, window_bounds = array<i64: 1, 256>}, {pipeline_mode = #tpu.pipeline_mode<synchronous>, transform_indices = @transform_21, window_bounds = array<i64: 256, 256>}, {pipeline_mode = #tpu.pipeline_mode<synchronous>, transform_indices = @transform_22, window_bounds = array<i64: 1, 256>}, {pipeline_mode = #tpu.pipeline_mode<synchronous>, transform_indices = @transform_23, window_bounds = array<i64: 256, 32>}, {pipeline_mode = #tpu.pipeline_mode<synchronous>, transform_indices = @transform_24, window_bounds = array<i64: 1, 32>}, {transform_indices = @transform_25, window_bounds = array<i64: 1, 8, 32>}]} {
    %c0 = arith.constant 0 : index
    %c0_0 = arith.constant 0 : index
    %c0_1 = arith.constant 0 : index
    %0 = vector.load %arg2[%c0, %c0_0, %c0_1] : memref<1x8x32xf32, #tpu.memory_space<vmem>>, vector<1x8x32xf32>
    %1 = vector.shape_cast %0 : vector<1x8x32xf32> to vector<8x32xf32>
    %c0_2 = arith.constant 0 : index
    %c0_3 = arith.constant 0 : index
    %c0_4 = arith.constant 0 : index
    %2 = vector.load %arg3[%c0_2, %c0_3, %c0_4] : memref<1x8x32xf32, #tpu.memory_space<vmem>>, vector<1x8x32xf32>
    %3 = vector.shape_cast %2 : vector<1x8x32xf32> to vector<8x32xf32>
    %c0_5 = arith.constant 0 : index
    %c0_6 = arith.constant 0 : index
    %c0_7 = arith.constant 0 : index
    %4 = vector.load %arg4[%c0_5, %c0_6, %c0_7] : memref<2x32x16xf32, #tpu.memory_space<vmem>>, vector<1x32x16xf32>
    %5 = vector.shape_cast %4 : vector<1x32x16xf32> to vector<32x16xf32>
    %cst = arith.constant dense<0.000000e+00> : vector<8x16xf32>
    %6 = tpu.matmul %1, %5, %cst {dimension_numbers = #tpu.dot_dimension_numbers<[1], [0], [0], [1], [0, 0, 1, 1], [], []>} : vector<8x32xf32>, vector<32x16xf32>, vector<8x16xf32> -> vector<8x16xf32>
    %c0_8 = arith.constant 0 : index
    %c0_9 = arith.constant 0 : index
    %c0_10 = arith.constant 0 : index
    %7 = vector.load %arg7[%c0_8, %c0_9, %c0_10] : memref<2x1x16xf32, #tpu.memory_space<vmem>>, vector<1x1x16xf32>
    %8 = vector.shape_cast %7 : vector<1x1x16xf32> to vector<1x16xf32>
    %9 = vector.broadcast %8 : vector<1x16xf32> to vector<8x16xf32>
    %10 = arith.addf %6, %9 : vector<8x16xf32>
    %c0_11 = arith.constant 0 : index
    %c0_12 = arith.constant 0 : index
    %c0_13 = arith.constant 0 : index
    %11 = vector.load %arg5[%c0_11, %c0_12, %c0_13] : memref<2x32x16xf32, #tpu.memory_space<vmem>>, vector<1x32x16xf32>
    %12 = vector.shape_cast %11 : vector<1x32x16xf32> to vector<32x16xf32>
    %cst_14 = arith.constant dense<0.000000e+00> : vector<8x16xf32>
    %13 = tpu.matmul %1, %12, %cst_14 {dimension_numbers = #tpu.dot_dimension_numbers<[1], [0], [0], [1], [0, 0, 1, 1], [], []>} : vector<8x32xf32>, vector<32x16xf32>, vector<8x16xf32> -> vector<8x16xf32>
    %c0_15 = arith.constant 0 : index
    %c0_16 = arith.constant 0 : index
    %c0_17 = arith.constant 0 : index
    %14 = vector.load %arg8[%c0_15, %c0_16, %c0_17] : memref<2x1x16xf32, #tpu.memory_space<vmem>>, vector<1x1x16xf32>
    %15 = vector.shape_cast %14 : vector<1x1x16xf32> to vector<1x16xf32>
    %16 = vector.broadcast %15 : vector<1x16xf32> to vector<8x16xf32>
    %17 = arith.addf %13, %16 : vector<8x16xf32>
    %c0_18 = arith.constant 0 : index
    %c0_19 = arith.constant 0 : index
    %c0_20 = arith.constant 0 : index
    %18 = vector.load %arg6[%c0_18, %c0_19, %c0_20] : memref<2x32x16xf32, #tpu.memory_space<vmem>>, vector<1x32x16xf32>
    %19 = vector.shape_cast %18 : vector<1x32x16xf32> to vector<32x16xf32>
    %cst_21 = arith.constant dense<0.000000e+00> : vector<8x16xf32>
    %20 = tpu.matmul %1, %19, %cst_21 {dimension_numbers = #tpu.dot_dimension_numbers<[1], [0], [0], [1], [0, 0, 1, 1], [], []>} : vector<8x32xf32>, vector<32x16xf32>, vector<8x16xf32> -> vector<8x16xf32>
    %c0_22 = arith.constant 0 : index
    %c0_23 = arith.constant 0 : index
    %c0_24 = arith.constant 0 : index
    %21 = vector.load %arg9[%c0_22, %c0_23, %c0_24] : memref<2x1x16xf32, #tpu.memory_space<vmem>>, vector<1x1x16xf32>
    %22 = vector.shape_cast %21 : vector<1x1x16xf32> to vector<1x16xf32>
    %23 = vector.broadcast %22 : vector<1x16xf32> to vector<8x16xf32>
    %24 = arith.addf %20, %23 : vector<8x16xf32>
    %cst_25 = arith.constant dense<0.000000e+00> : vector<8x8xf32>
    %25 = tpu.matmul %10, %17, %cst_25 {dimension_numbers = #tpu.dot_dimension_numbers<[1], [1], [0], [0], [0, 0, 1, 0], [], []>} : vector<8x16xf32>, vector<8x16xf32>, vector<8x8xf32> -> vector<8x8xf32>
    %cst_26 = arith.constant 2.500000e-01 : f32
    %26 = vector.broadcast %cst_26 : f32 to vector<8x8xf32>
    %27 = arith.mulf %25, %26 : vector<8x8xf32>
    %cst_27 = arith.constant dense<0xFF800000> : vector<8xf32>
    %28 = vector.multi_reduction <maximumf>, %27, %cst_27 [1] : vector<8x8xf32> to vector<8xf32>
    %29 = vector.shape_cast %28 : vector<8xf32> to vector<8x1xf32>
    %30 = vector.broadcast %29 : vector<8x1xf32> to vector<8x8xf32>
    %31 = arith.subf %27, %30 : vector<8x8xf32>
    %32 = math.exp %31 : vector<8x8xf32>
    %cst_28 = arith.constant dense<0.000000e+00> : vector<8xf32>
    %33 = vector.multi_reduction <add>, %32, %cst_28 [1] : vector<8x8xf32> to vector<8xf32>
    %34 = vector.shape_cast %33 : vector<8xf32> to vector<8x1xf32>
    %35 = vector.broadcast %34 : vector<8x1xf32> to vector<8x8xf32>
    %36 = arith.divf %32, %35 : vector<8x8xf32>
    %cst_29 = arith.constant dense<0.000000e+00> : vector<8x16xf32>
    %37 = tpu.matmul %36, %24, %cst_29 {dimension_numbers = #tpu.dot_dimension_numbers<[1], [0], [0], [1], [0, 0, 1, 1], [], []>} : vector<8x8xf32>, vector<8x16xf32>, vector<8x16xf32> -> vector<8x16xf32>
    %c0_30 = arith.constant 0 : index
    %c0_31 = arith.constant 0 : index
    %c0_32 = arith.constant 0 : index
    %38 = vector.load %arg10[%c0_30, %c0_31, %c0_32] : memref<2x16x32xf32, #tpu.memory_space<vmem>>, vector<1x16x32xf32>
    %39 = vector.shape_cast %38 : vector<1x16x32xf32> to vector<16x32xf32>
    %cst_33 = arith.constant dense<0.000000e+00> : vector<8x32xf32>
    %40 = tpu.matmul %37, %39, %cst_33 {dimension_numbers = #tpu.dot_dimension_numbers<[1], [0], [0], [1], [0, 0, 1, 1], [], []>} : vector<8x16xf32>, vector<16x32xf32>, vector<8x32xf32> -> vector<8x32xf32>
    %c1 = arith.constant 1 : index
    %c0_34 = arith.constant 0 : index
    %c0_35 = arith.constant 0 : index
    %41 = vector.load %arg4[%c1, %c0_34, %c0_35] : memref<2x32x16xf32, #tpu.memory_space<vmem>>, vector<1x32x16xf32>
    %42 = vector.shape_cast %41 : vector<1x32x16xf32> to vector<32x16xf32>
    %cst_36 = arith.constant dense<0.000000e+00> : vector<8x16xf32>
    %43 = tpu.matmul %1, %42, %cst_36 {dimension_numbers = #tpu.dot_dimension_numbers<[1], [0], [0], [1], [0, 0, 1, 1], [], []>} : vector<8x32xf32>, vector<32x16xf32>, vector<8x16xf32> -> vector<8x16xf32>
    %c1_37 = arith.constant 1 : index
    %c0_38 = arith.constant 0 : index
    %c0_39 = arith.constant 0 : index
    %44 = vector.load %arg7[%c1_37, %c0_38, %c0_39] : memref<2x1x16xf32, #tpu.memory_space<vmem>>, vector<1x1x16xf32>
    %45 = vector.shape_cast %44 : vector<1x1x16xf32> to vector<1x16xf32>
    %46 = vector.broadcast %45 : vector<1x16xf32> to vector<8x16xf32>
    %47 = arith.addf %43, %46 : vector<8x16xf32>
    %c1_40 = arith.constant 1 : index
    %c0_41 = arith.constant 0 : index
    %c0_42 = arith.constant 0 : index
    %48 = vector.load %arg5[%c1_40, %c0_41, %c0_42] : memref<2x32x16xf32, #tpu.memory_space<vmem>>, vector<1x32x16xf32>
    %49 = vector.shape_cast %48 : vector<1x32x16xf32> to vector<32x16xf32>
    %cst_43 = arith.constant dense<0.000000e+00> : vector<8x16xf32>
    %50 = tpu.matmul %1, %49, %cst_43 {dimension_numbers = #tpu.dot_dimension_numbers<[1], [0], [0], [1], [0, 0, 1, 1], [], []>} : vector<8x32xf32>, vector<32x16xf32>, vector<8x16xf32> -> vector<8x16xf32>
    %c1_44 = arith.constant 1 : index
    %c0_45 = arith.constant 0 : index
    %c0_46 = arith.constant 0 : index
    %51 = vector.load %arg8[%c1_44, %c0_45, %c0_46] : memref<2x1x16xf32, #tpu.memory_space<vmem>>, vector<1x1x16xf32>
    %52 = vector.shape_cast %51 : vector<1x1x16xf32> to vector<1x16xf32>
    %53 = vector.broadcast %52 : vector<1x16xf32> to vector<8x16xf32>
    %54 = arith.addf %50, %53 : vector<8x16xf32>
    %c1_47 = arith.constant 1 : index
    %c0_48 = arith.constant 0 : index
    %c0_49 = arith.constant 0 : index
    %55 = vector.load %arg6[%c1_47, %c0_48, %c0_49] : memref<2x32x16xf32, #tpu.memory_space<vmem>>, vector<1x32x16xf32>
    %56 = vector.shape_cast %55 : vector<1x32x16xf32> to vector<32x16xf32>
    %cst_50 = arith.constant dense<0.000000e+00> : vector<8x16xf32>
    %57 = tpu.matmul %1, %56, %cst_50 {dimension_numbers = #tpu.dot_dimension_numbers<[1], [0], [0], [1], [0, 0, 1, 1], [], []>} : vector<8x32xf32>, vector<32x16xf32>, vector<8x16xf32> -> vector<8x16xf32>
    %c1_51 = arith.constant 1 : index
    %c0_52 = arith.constant 0 : index
    %c0_53 = arith.constant 0 : index
    %58 = vector.load %arg9[%c1_51, %c0_52, %c0_53] : memref<2x1x16xf32, #tpu.memory_space<vmem>>, vector<1x1x16xf32>
    %59 = vector.shape_cast %58 : vector<1x1x16xf32> to vector<1x16xf32>
    %60 = vector.broadcast %59 : vector<1x16xf32> to vector<8x16xf32>
    %61 = arith.addf %57, %60 : vector<8x16xf32>
    %cst_54 = arith.constant dense<0.000000e+00> : vector<8x8xf32>
    %62 = tpu.matmul %47, %54, %cst_54 {dimension_numbers = #tpu.dot_dimension_numbers<[1], [1], [0], [0], [0, 0, 1, 0], [], []>} : vector<8x16xf32>, vector<8x16xf32>, vector<8x8xf32> -> vector<8x8xf32>
    %cst_55 = arith.constant 2.500000e-01 : f32
    %63 = vector.broadcast %cst_55 : f32 to vector<8x8xf32>
    %64 = arith.mulf %62, %63 : vector<8x8xf32>
    %cst_56 = arith.constant dense<0xFF800000> : vector<8xf32>
    %65 = vector.multi_reduction <maximumf>, %64, %cst_56 [1] : vector<8x8xf32> to vector<8xf32>
    %66 = vector.shape_cast %65 : vector<8xf32> to vector<8x1xf32>
    %67 = vector.broadcast %66 : vector<8x1xf32> to vector<8x8xf32>
    %68 = arith.subf %64, %67 : vector<8x8xf32>
    %69 = math.exp %68 : vector<8x8xf32>
    %cst_57 = arith.constant dense<0.000000e+00> : vector<8xf32>
    %70 = vector.multi_reduction <add>, %69, %cst_57 [1] : vector<8x8xf32> to vector<8xf32>
    %71 = vector.shape_cast %70 : vector<8xf32> to vector<8x1xf32>
    %72 = vector.broadcast %71 : vector<8x1xf32> to vector<8x8xf32>
    %73 = arith.divf %69, %72 : vector<8x8xf32>
    %cst_58 = arith.constant dense<0.000000e+00> : vector<8x16xf32>
    %74 = tpu.matmul %73, %61, %cst_58 {dimension_numbers = #tpu.dot_dimension_numbers<[1], [0], [0], [1], [0, 0, 1, 1], [], []>} : vector<8x8xf32>, vector<8x16xf32>, vector<8x16xf32> -> vector<8x16xf32>
    %c1_59 = arith.constant 1 : index
    %c0_60 = arith.constant 0 : index
    %c0_61 = arith.constant 0 : index
    %75 = vector.load %arg10[%c1_59, %c0_60, %c0_61] : memref<2x16x32xf32, #tpu.memory_space<vmem>>, vector<1x16x32xf32>
    %76 = vector.shape_cast %75 : vector<1x16x32xf32> to vector<16x32xf32>
    %cst_62 = arith.constant dense<0.000000e+00> : vector<8x32xf32>
    %77 = tpu.matmul %74, %76, %cst_62 {dimension_numbers = #tpu.dot_dimension_numbers<[1], [0], [0], [1], [0, 0, 1, 1], [], []>} : vector<8x16xf32>, vector<16x32xf32>, vector<8x32xf32> -> vector<8x32xf32>
    %78 = arith.addf %40, %77 : vector<8x32xf32>
    %c0_63 = arith.constant 0 : index
    %c0_64 = arith.constant 0 : index
    %79 = vector.load %arg11[%c0_63, %c0_64] : memref<1x32xf32, #tpu.memory_space<vmem>>, vector<1x32xf32>
    %80 = vector.broadcast %79 : vector<1x32xf32> to vector<8x32xf32>
    %81 = arith.addf %78, %80 : vector<8x32xf32>
    %82 = arith.addf %1, %81 : vector<8x32xf32>
    %c0_65 = arith.constant 0 : index
    %83 = memref.load %arg1[%c0_65] : memref<10xf32, #tpu.memory_space<smem>>
    %c1_66 = arith.constant 1 : index
    %84 = memref.load %arg1[%c1_66] : memref<10xf32, #tpu.memory_space<smem>>
    %85 = vector.broadcast %84 : f32 to vector<8x32xf32>
    %86 = arith.addf %82, %85 : vector<8x32xf32>
    %87 = math.sin %86 : vector<8x32xf32>
    %88 = vector.broadcast %83 : f32 to vector<8x32xf32>
    %89 = arith.mulf %88, %87 : vector<8x32xf32>
    %c0_67 = arith.constant 0 : index
    %c0_68 = arith.constant 0 : index
    %c0_69 = arith.constant 0 : index
    %90 = vector.load %arg12[%c0_67, %c0_68, %c0_69] : memref<2x32x16xf32, #tpu.memory_space<vmem>>, vector<1x32x16xf32>
    %91 = vector.shape_cast %90 : vector<1x32x16xf32> to vector<32x16xf32>
    %cst_70 = arith.constant dense<0.000000e+00> : vector<8x16xf32>
    %92 = tpu.matmul %89, %91, %cst_70 {dimension_numbers = #tpu.dot_dimension_numbers<[1], [0], [0], [1], [0, 0, 1, 1], [], []>} : vector<8x32xf32>, vector<32x16xf32>, vector<8x16xf32> -> vector<8x16xf32>
    %c0_71 = arith.constant 0 : index
    %c0_72 = arith.constant 0 : index
    %c0_73 = arith.constant 0 : index
    %93 = vector.load %arg15[%c0_71, %c0_72, %c0_73] : memref<2x1x16xf32, #tpu.memory_space<vmem>>, vector<1x1x16xf32>
    %94 = vector.shape_cast %93 : vector<1x1x16xf32> to vector<1x16xf32>
    %95 = vector.broadcast %94 : vector<1x16xf32> to vector<8x16xf32>
    %96 = arith.addf %92, %95 : vector<8x16xf32>
    %c0_74 = arith.constant 0 : index
    %c0_75 = arith.constant 0 : index
    %c0_76 = arith.constant 0 : index
    %97 = vector.load %arg13[%c0_74, %c0_75, %c0_76] : memref<2x32x16xf32, #tpu.memory_space<vmem>>, vector<1x32x16xf32>
    %98 = vector.shape_cast %97 : vector<1x32x16xf32> to vector<32x16xf32>
    %cst_77 = arith.constant dense<0.000000e+00> : vector<8x16xf32>
    %99 = tpu.matmul %3, %98, %cst_77 {dimension_numbers = #tpu.dot_dimension_numbers<[1], [0], [0], [1], [0, 0, 1, 1], [], []>} : vector<8x32xf32>, vector<32x16xf32>, vector<8x16xf32> -> vector<8x16xf32>
    %c0_78 = arith.constant 0 : index
    %c0_79 = arith.constant 0 : index
    %c0_80 = arith.constant 0 : index
    %100 = vector.load %arg16[%c0_78, %c0_79, %c0_80] : memref<2x1x16xf32, #tpu.memory_space<vmem>>, vector<1x1x16xf32>
    %101 = vector.shape_cast %100 : vector<1x1x16xf32> to vector<1x16xf32>
    %102 = vector.broadcast %101 : vector<1x16xf32> to vector<8x16xf32>
    %103 = arith.addf %99, %102 : vector<8x16xf32>
    %c0_81 = arith.constant 0 : index
    %c0_82 = arith.constant 0 : index
    %c0_83 = arith.constant 0 : index
    %104 = vector.load %arg14[%c0_81, %c0_82, %c0_83] : memref<2x32x16xf32, #tpu.memory_space<vmem>>, vector<1x32x16xf32>
    %105 = vector.shape_cast %104 : vector<1x32x16xf32> to vector<32x16xf32>
    %cst_84 = arith.constant dense<0.000000e+00> : vector<8x16xf32>
    %106 = tpu.matmul %3, %105, %cst_84 {dimension_numbers = #tpu.dot_dimension_numbers<[1], [0], [0], [1], [0, 0, 1, 1], [], []>} : vector<8x32xf32>, vector<32x16xf32>, vector<8x16xf32> -> vector<8x16xf32>
    %c0_85 = arith.constant 0 : index
    %c0_86 = arith.constant 0 : index
    %c0_87 = arith.constant 0 : index
    %107 = vector.load %arg17[%c0_85, %c0_86, %c0_87] : memref<2x1x16xf32, #tpu.memory_space<vmem>>, vector<1x1x16xf32>
    %108 = vector.shape_cast %107 : vector<1x1x16xf32> to vector<1x16xf32>
    %109 = vector.broadcast %108 : vector<1x16xf32> to vector<8x16xf32>
    %110 = arith.addf %106, %109 : vector<8x16xf32>
    %cst_88 = arith.constant dense<0.000000e+00> : vector<8x8xf32>
    %111 = tpu.matmul %96, %103, %cst_88 {dimension_numbers = #tpu.dot_dimension_numbers<[1], [1], [0], [0], [0, 0, 1, 0], [], []>} : vector<8x16xf32>, vector<8x16xf32>, vector<8x8xf32> -> vector<8x8xf32>
    %cst_89 = arith.constant 2.500000e-01 : f32
    %112 = vector.broadcast %cst_89 : f32 to vector<8x8xf32>
    %113 = arith.mulf %111, %112 : vector<8x8xf32>
    %cst_90 = arith.constant dense<0xFF800000> : vector<8xf32>
    %114 = vector.multi_reduction <maximumf>, %113, %cst_90 [1] : vector<8x8xf32> to vector<8xf32>
    %115 = vector.shape_cast %114 : vector<8xf32> to vector<8x1xf32>
    %116 = vector.broadcast %115 : vector<8x1xf32> to vector<8x8xf32>
    %117 = arith.subf %113, %116 : vector<8x8xf32>
    %118 = math.exp %117 : vector<8x8xf32>
    %cst_91 = arith.constant dense<0.000000e+00> : vector<8xf32>
    %119 = vector.multi_reduction <add>, %118, %cst_91 [1] : vector<8x8xf32> to vector<8xf32>
    %120 = vector.shape_cast %119 : vector<8xf32> to vector<8x1xf32>
    %121 = vector.broadcast %120 : vector<8x1xf32> to vector<8x8xf32>
    %122 = arith.divf %118, %121 : vector<8x8xf32>
    %cst_92 = arith.constant dense<0.000000e+00> : vector<8x16xf32>
    %123 = tpu.matmul %122, %110, %cst_92 {dimension_numbers = #tpu.dot_dimension_numbers<[1], [0], [0], [1], [0, 0, 1, 1], [], []>} : vector<8x8xf32>, vector<8x16xf32>, vector<8x16xf32> -> vector<8x16xf32>
    %c0_93 = arith.constant 0 : index
    %c0_94 = arith.constant 0 : index
    %c0_95 = arith.constant 0 : index
    %124 = vector.load %arg18[%c0_93, %c0_94, %c0_95] : memref<2x16x32xf32, #tpu.memory_space<vmem>>, vector<1x16x32xf32>
    %125 = vector.shape_cast %124 : vector<1x16x32xf32> to vector<16x32xf32>
    %cst_96 = arith.constant dense<0.000000e+00> : vector<8x32xf32>
    %126 = tpu.matmul %123, %125, %cst_96 {dimension_numbers = #tpu.dot_dimension_numbers<[1], [0], [0], [1], [0, 0, 1, 1], [], []>} : vector<8x16xf32>, vector<16x32xf32>, vector<8x32xf32> -> vector<8x32xf32>
    %c1_97 = arith.constant 1 : index
    %c0_98 = arith.constant 0 : index
    %c0_99 = arith.constant 0 : index
    %127 = vector.load %arg12[%c1_97, %c0_98, %c0_99] : memref<2x32x16xf32, #tpu.memory_space<vmem>>, vector<1x32x16xf32>
    %128 = vector.shape_cast %127 : vector<1x32x16xf32> to vector<32x16xf32>
    %cst_100 = arith.constant dense<0.000000e+00> : vector<8x16xf32>
    %129 = tpu.matmul %89, %128, %cst_100 {dimension_numbers = #tpu.dot_dimension_numbers<[1], [0], [0], [1], [0, 0, 1, 1], [], []>} : vector<8x32xf32>, vector<32x16xf32>, vector<8x16xf32> -> vector<8x16xf32>
    %c1_101 = arith.constant 1 : index
    %c0_102 = arith.constant 0 : index
    %c0_103 = arith.constant 0 : index
    %130 = vector.load %arg15[%c1_101, %c0_102, %c0_103] : memref<2x1x16xf32, #tpu.memory_space<vmem>>, vector<1x1x16xf32>
    %131 = vector.shape_cast %130 : vector<1x1x16xf32> to vector<1x16xf32>
    %132 = vector.broadcast %131 : vector<1x16xf32> to vector<8x16xf32>
    %133 = arith.addf %129, %132 : vector<8x16xf32>
    %c1_104 = arith.constant 1 : index
    %c0_105 = arith.constant 0 : index
    %c0_106 = arith.constant 0 : index
    %134 = vector.load %arg13[%c1_104, %c0_105, %c0_106] : memref<2x32x16xf32, #tpu.memory_space<vmem>>, vector<1x32x16xf32>
    %135 = vector.shape_cast %134 : vector<1x32x16xf32> to vector<32x16xf32>
    %cst_107 = arith.constant dense<0.000000e+00> : vector<8x16xf32>
    %136 = tpu.matmul %3, %135, %cst_107 {dimension_numbers = #tpu.dot_dimension_numbers<[1], [0], [0], [1], [0, 0, 1, 1], [], []>} : vector<8x32xf32>, vector<32x16xf32>, vector<8x16xf32> -> vector<8x16xf32>
    %c1_108 = arith.constant 1 : index
    %c0_109 = arith.constant 0 : index
    %c0_110 = arith.constant 0 : index
    %137 = vector.load %arg16[%c1_108, %c0_109, %c0_110] : memref<2x1x16xf32, #tpu.memory_space<vmem>>, vector<1x1x16xf32>
    %138 = vector.shape_cast %137 : vector<1x1x16xf32> to vector<1x16xf32>
    %139 = vector.broadcast %138 : vector<1x16xf32> to vector<8x16xf32>
    %140 = arith.addf %136, %139 : vector<8x16xf32>
    %c1_111 = arith.constant 1 : index
    %c0_112 = arith.constant 0 : index
    %c0_113 = arith.constant 0 : index
    %141 = vector.load %arg14[%c1_111, %c0_112, %c0_113] : memref<2x32x16xf32, #tpu.memory_space<vmem>>, vector<1x32x16xf32>
    %142 = vector.shape_cast %141 : vector<1x32x16xf32> to vector<32x16xf32>
    %cst_114 = arith.constant dense<0.000000e+00> : vector<8x16xf32>
    %143 = tpu.matmul %3, %142, %cst_114 {dimension_numbers = #tpu.dot_dimension_numbers<[1], [0], [0], [1], [0, 0, 1, 1], [], []>} : vector<8x32xf32>, vector<32x16xf32>, vector<8x16xf32> -> vector<8x16xf32>
    %c1_115 = arith.constant 1 : index
    %c0_116 = arith.constant 0 : index
    %c0_117 = arith.constant 0 : index
    %144 = vector.load %arg17[%c1_115, %c0_116, %c0_117] : memref<2x1x16xf32, #tpu.memory_space<vmem>>, vector<1x1x16xf32>
    %145 = vector.shape_cast %144 : vector<1x1x16xf32> to vector<1x16xf32>
    %146 = vector.broadcast %145 : vector<1x16xf32> to vector<8x16xf32>
    %147 = arith.addf %143, %146 : vector<8x16xf32>
    %cst_118 = arith.constant dense<0.000000e+00> : vector<8x8xf32>
    %148 = tpu.matmul %133, %140, %cst_118 {dimension_numbers = #tpu.dot_dimension_numbers<[1], [1], [0], [0], [0, 0, 1, 0], [], []>} : vector<8x16xf32>, vector<8x16xf32>, vector<8x8xf32> -> vector<8x8xf32>
    %cst_119 = arith.constant 2.500000e-01 : f32
    %149 = vector.broadcast %cst_119 : f32 to vector<8x8xf32>
    %150 = arith.mulf %148, %149 : vector<8x8xf32>
    %cst_120 = arith.constant dense<0xFF800000> : vector<8xf32>
    %151 = vector.multi_reduction <maximumf>, %150, %cst_120 [1] : vector<8x8xf32> to vector<8xf32>
    %152 = vector.shape_cast %151 : vector<8xf32> to vector<8x1xf32>
    %153 = vector.broadcast %152 : vector<8x1xf32> to vector<8x8xf32>
    %154 = arith.subf %150, %153 : vector<8x8xf32>
    %155 = math.exp %154 : vector<8x8xf32>
    %cst_121 = arith.constant dense<0.000000e+00> : vector<8xf32>
    %156 = vector.multi_reduction <add>, %155, %cst_121 [1] : vector<8x8xf32> to vector<8xf32>
    %157 = vector.shape_cast %156 : vector<8xf32> to vector<8x1xf32>
    %158 = vector.broadcast %157 : vector<8x1xf32> to vector<8x8xf32>
    %159 = arith.divf %155, %158 : vector<8x8xf32>
    %cst_122 = arith.constant dense<0.000000e+00> : vector<8x16xf32>
    %160 = tpu.matmul %159, %147, %cst_122 {dimension_numbers = #tpu.dot_dimension_numbers<[1], [0], [0], [1], [0, 0, 1, 1], [], []>} : vector<8x8xf32>, vector<8x16xf32>, vector<8x16xf32> -> vector<8x16xf32>
    %c1_123 = arith.constant 1 : index
    %c0_124 = arith.constant 0 : index
    %c0_125 = arith.constant 0 : index
    %161 = vector.load %arg18[%c1_123, %c0_124, %c0_125] : memref<2x16x32xf32, #tpu.memory_space<vmem>>, vector<1x16x32xf32>
    %162 = vector.shape_cast %161 : vector<1x16x32xf32> to vector<16x32xf32>
    %cst_126 = arith.constant dense<0.000000e+00> : vector<8x32xf32>
    %163 = tpu.matmul %160, %162, %cst_126 {dimension_numbers = #tpu.dot_dimension_numbers<[1], [0], [0], [1], [0, 0, 1, 1], [], []>} : vector<8x16xf32>, vector<16x32xf32>, vector<8x32xf32> -> vector<8x32xf32>
    %164 = arith.addf %126, %163 : vector<8x32xf32>
    %c0_127 = arith.constant 0 : index
    %c0_128 = arith.constant 0 : index
    %165 = vector.load %arg19[%c0_127, %c0_128] : memref<1x32xf32, #tpu.memory_space<vmem>>, vector<1x32xf32>
    %166 = vector.broadcast %165 : vector<1x32xf32> to vector<8x32xf32>
    %167 = arith.addf %164, %166 : vector<8x32xf32>
    %168 = arith.addf %82, %167 : vector<8x32xf32>
    %c2 = arith.constant 2 : index
    %169 = memref.load %arg1[%c2] : memref<10xf32, #tpu.memory_space<smem>>
    %c3 = arith.constant 3 : index
    %170 = memref.load %arg1[%c3] : memref<10xf32, #tpu.memory_space<smem>>
    %171 = vector.broadcast %170 : f32 to vector<8x32xf32>
    %172 = arith.addf %168, %171 : vector<8x32xf32>
    %173 = math.sin %172 : vector<8x32xf32>
    %174 = vector.broadcast %169 : f32 to vector<8x32xf32>
    %175 = arith.mulf %174, %173 : vector<8x32xf32>
    %c0_129 = arith.constant 0 : index
    %c0_130 = arith.constant 0 : index
    %176 = vector.load %arg20[%c0_129, %c0_130] : memref<32x256xf32, #tpu.memory_space<vmem>>, vector<32x256xf32>
    %cst_131 = arith.constant dense<0.000000e+00> : vector<8x256xf32>
    %177 = tpu.matmul %175, %176, %cst_131 {dimension_numbers = #tpu.dot_dimension_numbers<[1], [0], [0], [1], [0, 0, 1, 1], [], []>} : vector<8x32xf32>, vector<32x256xf32>, vector<8x256xf32> -> vector<8x256xf32>
    %c0_132 = arith.constant 0 : index
    %c0_133 = arith.constant 0 : index
    %178 = vector.load %arg21[%c0_132, %c0_133] : memref<1x256xf32, #tpu.memory_space<vmem>>, vector<1x256xf32>
    %179 = vector.broadcast %178 : vector<1x256xf32> to vector<8x256xf32>
    %180 = arith.addf %177, %179 : vector<8x256xf32>
    %c4 = arith.constant 4 : index
    %181 = memref.load %arg1[%c4] : memref<10xf32, #tpu.memory_space<smem>>
    %c5 = arith.constant 5 : index
    %182 = memref.load %arg1[%c5] : memref<10xf32, #tpu.memory_space<smem>>
    %183 = vector.broadcast %182 : f32 to vector<8x256xf32>
    %184 = arith.addf %180, %183 : vector<8x256xf32>
    %185 = math.sin %184 : vector<8x256xf32>
    %186 = vector.broadcast %181 : f32 to vector<8x256xf32>
    %187 = arith.mulf %186, %185 : vector<8x256xf32>
    %c0_134 = arith.constant 0 : index
    %c0_135 = arith.constant 0 : index
    %188 = vector.load %arg22[%c0_134, %c0_135] : memref<256x256xf32, #tpu.memory_space<vmem>>, vector<256x256xf32>
    %cst_136 = arith.constant dense<0.000000e+00> : vector<8x256xf32>
    %189 = tpu.matmul %187, %188, %cst_136 {dimension_numbers = #tpu.dot_dimension_numbers<[1], [0], [0], [1], [0, 0, 1, 1], [], []>} : vector<8x256xf32>, vector<256x256xf32>, vector<8x256xf32> -> vector<8x256xf32>
    %c0_137 = arith.constant 0 : index
    %c0_138 = arith.constant 0 : index
    %190 = vector.load %arg23[%c0_137, %c0_138] : memref<1x256xf32, #tpu.memory_space<vmem>>, vector<1x256xf32>
    %191 = vector.broadcast %190 : vector<1x256xf32> to vector<8x256xf32>
    %192 = arith.addf %189, %191 : vector<8x256xf32>
    %c6 = arith.constant 6 : index
    %193 = memref.load %arg1[%c6] : memref<10xf32, #tpu.memory_space<smem>>
    %c7 = arith.constant 7 : index
    %194 = memref.load %arg1[%c7] : memref<10xf32, #tpu.memory_space<smem>>
    %195 = vector.broadcast %194 : f32 to vector<8x256xf32>
    %196 = arith.addf %192, %195 : vector<8x256xf32>
    %197 = math.sin %196 : vector<8x256xf32>
    %198 = vector.broadcast %193 : f32 to vector<8x256xf32>
    %199 = arith.mulf %198, %197 : vector<8x256xf32>
    %c0_139 = arith.constant 0 : index
    %c0_140 = arith.constant 0 : index
    %200 = vector.load %arg24[%c0_139, %c0_140] : memref<256x32xf32, #tpu.memory_space<vmem>>, vector<256x32xf32>
    %cst_141 = arith.constant dense<0.000000e+00> : vector<8x32xf32>
    %201 = tpu.matmul %199, %200, %cst_141 {dimension_numbers = #tpu.dot_dimension_numbers<[1], [0], [0], [1], [0, 0, 1, 1], [], []>} : vector<8x256xf32>, vector<256x32xf32>, vector<8x32xf32> -> vector<8x32xf32>
    %c0_142 = arith.constant 0 : index
    %c0_143 = arith.constant 0 : index
    %202 = vector.load %arg25[%c0_142, %c0_143] : memref<1x32xf32, #tpu.memory_space<vmem>>, vector<1x32xf32>
    %203 = vector.broadcast %202 : vector<1x32xf32> to vector<8x32xf32>
    %204 = arith.addf %201, %203 : vector<8x32xf32>
    %205 = arith.addf %168, %204 : vector<8x32xf32>
    %c0_144 = arith.constant 0 : index
    %c0_145 = arith.constant 0 : index
    %c0_146 = arith.constant 0 : index
    %206 = vector.load %arg26[%c0_144, %c0_145, %c0_146] : memref<1x8x32xf32, #tpu.memory_space<vmem>>, vector<1x8x32xf32>
    %207 = vector.shape_cast %206 : vector<1x8x32xf32> to vector<8x32xf32>
    %208 = vector.shape_cast %205 : vector<8x32xf32> to vector<1x8x32xf32>
    tpu.vector_store %arg26[%c0_144, %c0_145, %c0_146], %208 {strides = array<i32>} : memref<1x8x32xf32, #tpu.memory_space<vmem>>, vector<1x8x32xf32>,
    return
  }
  func.func @transform_0(%arg0: i32) -> i32 {
    %c0_i32 = arith.constant 0 : i32
    %c0_i32_0 = arith.constant 0 : i32
    return %c0_i32 : i32
  }
  func.func @transform_1(%arg0: i32) -> (i32, i32, i32) {
    %c0_i32 = arith.constant 0 : i32
    %c0_i32_0 = arith.constant 0 : i32
    %c0_i32_1 = arith.constant 0 : i32
    return %arg0, %c0_i32, %c0_i32_0 : i32, i32, i32
  }
  func.func @transform_2(%arg0: i32) -> (i32, i32, i32) {
    %c0_i32 = arith.constant 0 : i32
    %c0_i32_0 = arith.constant 0 : i32
    %c0_i32_1 = arith.constant 0 : i32
    return %arg0, %c0_i32, %c0_i32_0 : i32, i32, i32
  }
  func.func @transform_3(%arg0: i32) -> (i32, i32, i32) {
    %c0_i32 = arith.constant 0 : i32
    %c0_i32_0 = arith.constant 0 : i32
    %c0_i32_1 = arith.constant 0 : i32
    %c0_i32_2 = arith.constant 0 : i32
    return %c0_i32, %c0_i32_0, %c0_i32_1 : i32, i32, i32
  }
  func.func @transform_4(%arg0: i32) -> (i32, i32, i32) {
    %c0_i32 = arith.constant 0 : i32
    %c0_i32_0 = arith.constant 0 : i32
    %c0_i32_1 = arith.constant 0 : i32
    %c0_i32_2 = arith.constant 0 : i32
    return %c0_i32, %c0_i32_0, %c0_i32_1 : i32, i32, i32
  }
  func.func @transform_5(%arg0: i32) -> (i32, i32, i32) {
    %c0_i32 = arith.constant 0 : i32
    %c0_i32_0 = arith.constant 0 : i32
    %c0_i32_1 = arith.constant 0 : i32
    %c0_i32_2 = arith.constant 0 : i32
    return %c0_i32, %c0_i32_0, %c0_i32_1 : i32, i32, i32
  }
  func.func @transform_6(%arg0: i32) -> (i32, i32, i32) {
    %c0_i32 = arith.constant 0 : i32
    %c0_i32_0 = arith.constant 0 : i32
    %c0_i32_1 = arith.constant 0 : i32
    %c0_i32_2 = arith.constant 0 : i32
    return %c0_i32, %c0_i32_0, %c0_i32_1 : i32, i32, i32
  }
  func.func @transform_7(%arg0: i32) -> (i32, i32, i32) {
    %c0_i32 = arith.constant 0 : i32
    %c0_i32_0 = arith.constant 0 : i32
    %c0_i32_1 = arith.constant 0 : i32
    %c0_i32_2 = arith.constant 0 : i32
    return %c0_i32, %c0_i32_0, %c0_i32_1 : i32, i32, i32
  }
  func.func @transform_8(%arg0: i32) -> (i32, i32, i32) {
    %c0_i32 = arith.constant 0 : i32
    %c0_i32_0 = arith.constant 0 : i32
    %c0_i32_1 = arith.constant 0 : i32
    %c0_i32_2 = arith.constant 0 : i32
    return %c0_i32, %c0_i32_0, %c0_i32_1 : i32, i32, i32
  }
  func.func @transform_9(%arg0: i32) -> (i32, i32, i32) {
    %c0_i32 = arith.constant 0 : i32
    %c0_i32_0 = arith.constant 0 : i32
    %c0_i32_1 = arith.constant 0 : i32
    %c0_i32_2 = arith.constant 0 : i32
    return %c0_i32, %c0_i32_0, %c0_i32_1 : i32, i32, i32
  }
  func.func @transform_10(%arg0: i32) -> (i32, i32) {
    %c0_i32 = arith.constant 0 : i32
    %c0_i32_0 = arith.constant 0 : i32
    %c0_i32_1 = arith.constant 0 : i32
    return %c0_i32, %c0_i32_0 : i32, i32
  }
  func.func @transform_11(%arg0: i32) -> (i32, i32, i32) {
    %c0_i32 = arith.constant 0 : i32
    %c0_i32_0 = arith.constant 0 : i32
    %c0_i32_1 = arith.constant 0 : i32
    %c0_i32_2 = arith.constant 0 : i32
    return %c0_i32, %c0_i32_0, %c0_i32_1 : i32, i32, i32
  }
  func.func @transform_12(%arg0: i32) -> (i32, i32, i32) {
    %c0_i32 = arith.constant 0 : i32
    %c0_i32_0 = arith.constant 0 : i32
    %c0_i32_1 = arith.constant 0 : i32
    %c0_i32_2 = arith.constant 0 : i32
    return %c0_i32, %c0_i32_0, %c0_i32_1 : i32, i32, i32
  }
  func.func @transform_13(%arg0: i32) -> (i32, i32, i32) {
    %c0_i32 = arith.constant 0 : i32
    %c0_i32_0 = arith.constant 0 : i32
    %c0_i32_1 = arith.constant 0 : i32
    %c0_i32_2 = arith.constant 0 : i32
    return %c0_i32, %c0_i32_0, %c0_i32_1 : i32, i32, i32
  }
  func.func @transform_14(%arg0: i32) -> (i32, i32, i32) {
    %c0_i32 = arith.constant 0 : i32
    %c0_i32_0 = arith.constant 0 : i32
    %c0_i32_1 = arith.constant 0 : i32
    %c0_i32_2 = arith.constant 0 : i32
    return %c0_i32, %c0_i32_0, %c0_i32_1 : i32, i32, i32
  }
  func.func @transform_15(%arg0: i32) -> (i32, i32, i32) {
    %c0_i32 = arith.constant 0 : i32
    %c0_i32_0 = arith.constant 0 : i32
    %c0_i32_1 = arith.constant 0 : i32
    %c0_i32_2 = arith.constant 0 : i32
    return %c0_i32, %c0_i32_0, %c0_i32_1 : i32, i32, i32
  }
  func.func @transform_16(%arg0: i32) -> (i32, i32, i32) {
    %c0_i32 = arith.constant 0 : i32
    %c0_i32_0 = arith.constant 0 : i32
    %c0_i32_1 = arith.constant 0 : i32
    %c0_i32_2 = arith.constant 0 : i32
    return %c0_i32, %c0_i32_0, %c0_i32_1 : i32, i32, i32
  }
  func.func @transform_17(%arg0: i32) -> (i32, i32, i32) {
    %c0_i32 = arith.constant 0 : i32
    %c0_i32_0 = arith.constant 0 : i32
    %c0_i32_1 = arith.constant 0 : i32
    %c0_i32_2 = arith.constant 0 : i32
    return %c0_i32, %c0_i32_0, %c0_i32_1 : i32, i32, i32
  }
  func.func @transform_18(%arg0: i32) -> (i32, i32) {
    %c0_i32 = arith.constant 0 : i32
    %c0_i32_0 = arith.constant 0 : i32
    %c0_i32_1 = arith.constant 0 : i32
    return %c0_i32, %c0_i32_0 : i32, i32
  }
  func.func @transform_19(%arg0: i32) -> (i32, i32) {
    %c0_i32 = arith.constant 0 : i32
    %c0_i32_0 = arith.constant 0 : i32
    %c0_i32_1 = arith.constant 0 : i32
    return %c0_i32, %c0_i32_0 : i32, i32
  }
  func.func @transform_20(%arg0: i32) -> (i32, i32) {
    %c0_i32 = arith.constant 0 : i32
    %c0_i32_0 = arith.constant 0 : i32
    %c0_i32_1 = arith.constant 0 : i32
    return %c0_i32, %c0_i32_0 : i32, i32
  }
  func.func @transform_21(%arg0: i32) -> (i32, i32) {
    %c0_i32 = arith.constant 0 : i32
    %c0_i32_0 = arith.constant 0 : i32
    %c0_i32_1 = arith.constant 0 : i32
    return %c0_i32, %c0_i32_0 : i32, i32
  }
  func.func @transform_22(%arg0: i32) -> (i32, i32) {
    %c0_i32 = arith.constant 0 : i32
    %c0_i32_0 = arith.constant 0 : i32
    %c0_i32_1 = arith.constant 0 : i32
    return %c0_i32, %c0_i32_0 : i32, i32
  }
  func.func @transform_23(%arg0: i32) -> (i32, i32) {
    %c0_i32 = arith.constant 0 : i32
    %c0_i32_0 = arith.constant 0 : i32
    %c0_i32_1 = arith.constant 0 : i32
    return %c0_i32, %c0_i32_0 : i32, i32
  }
  func.func @transform_24(%arg0: i32) -> (i32, i32) {
    %c0_i32 = arith.constant 0 : i32
    %c0_i32_0 = arith.constant 0 : i32
    %c0_i32_1 = arith.constant 0 : i32
    return %c0_i32, %c0_i32_0 : i32, i32
  }
  func.func @transform_25(%arg0: i32) -> (i32, i32, i32) {
    %c0_i32 = arith.constant 0 : i32
    %c0_i32_0 = arith.constant 0 : i32
    %c0_i32_1 = arith.constant 0 : i32
    return %arg0, %c0_i32, %c0_i32_0 : i32, i32, i32
  }
}

</mosaic_0001>

<bundles_post_ra>
// kernel: tpu_custom_call.1
= control target key start
LH: loop header
LB: loop body
LE: loop exit
PB: predicated region body
PF: predicated region fallthrough
CT: control target
= control target key end

     0   :  { %s5722_s0 = inlined_call_operand.vmem [shape: f32[10], index: 0, kind: input, shape index: {}]   ;;  %s5723_s1 = inlined_call_operand.vmem [shape: f32[2,8,32], index: 1, kind: input, shape index: {}]   ;;  %s5724_s2 = inlined_call_operand.vmem [shape: f32[2,8,32], index: 2, kind: input, shape index: {}]   ;;  %s5725_s3 = inlined_call_operand.vmem [shape: f32[2,32,16], index: 3, kind: input, shape index: {}]   ;;  %s5726_s4 = inlined_call_operand.vmem [shape: f32[2,32,16], index: 4, kind: input, shape index: {}]   ;;  %s5727_s5 = inlined_call_operand.vmem [shape: f32[2,32,16], index: 5, kind: input, shape index: {}]   ;;  %s5728_s6 = inlined_call_operand.vmem [shape: f32[2,1,16], index: 6, kind: input, shape index: {}]   ;;  %s5729_s7 = inlined_call_operand.vmem [shape: f32[2,1,16], index: 7, kind: input, shape index: {}]   ;;  %s5730_s8 = inlined_call_operand.vmem [shape: f32[2,1,16], index: 8, kind: input, shape index: {}]   ;;  %s5731_s9 = inlined_call_operand.vmem [shape: f32[2,16,32], index: 9, kind: input, shape index: {}]   ;;  %s5732_s10 = inlined_call_operand.vmem [shape: f32[1,32], index: 10, kind: input, shape index: {}]   ;;  %s5733_s11 = inlined_call_operand.vmem [shape: f32[2,32,16], index: 11, kind: input, shape index: {}]   ;;  %s5734_s12 = inlined_call_operand.vmem [shape: f32[2,32,16], index: 12, kind: input, shape index: {}]   ;;  %s5735_s13 = inlined_call_operand.vmem [shape: f32[2,32,16], index: 13, kind: input, shape index: {}]   ;;  %s5736_s14 = inlined_call_operand.vmem [shape: f32[2,1,16], index: 14, kind: input, shape index: {}]   ;;  %s5737_s15 = inlined_call_operand.vmem [shape: f32[2,1,16], index: 15, kind: input, shape index: {}]   ;;  %s5738_s16 = inlined_call_operand.vmem [shape: f32[2,1,16], index: 16, kind: input, shape index: {}]   ;;  %s5739_s17 = inlined_call_operand.vmem [shape: f32[2,16,32], index: 17, kind: input, shape index: {}]   ;;  %s5740_s18 = inlined_call_operand.vmem [shape: f32[1,32], index: 18, kind: input, shape index: {}]   ;;  %s5741_s19 = inlined_call_operand.vmem [shape: f32[32,256], index: 19, kind: input, shape index: {}]   ;;  %s5742_s20 = inlined_call_operand.vmem [shape: f32[1,256], index: 20, kind: input, shape index: {}]   ;;  %s5743_s21 = inlined_call_operand.vmem [shape: f32[256,256], index: 21, kind: input, shape index: {}]   ;;  %s5744_s22 = inlined_call_operand.vmem [shape: f32[1,256], index: 22, kind: input, shape index: {}]   ;;  %s5745_s23 = inlined_call_operand.vmem [shape: f32[256,32], index: 23, kind: input, shape index: {}]   ;;  %s5746_s24 = inlined_call_operand.vmem [shape: f32[1,32], index: 24, kind: input, shape index: {}]   ;;  %s5747_s25 = inlined_call_operand.hbm [shape: f32[2,8,32], index: 25, kind: output, shape index: {}]  }
   0x1   :  { %5768 = sst [smem:[#allocation14_spill]] %s5722_s0 }
   0x2   :  { %5769 = sst [smem:[#allocation15_spill]] %s5723_s1 }
   0x3   :  { %5770 = sst [smem:[#allocation16_spill]] %s5724_s2 }
   0x4   :  { %5771 = sst [smem:[#allocation17_spill]] %s5725_s3 }
   0x5   :  { %5772 = sst [smem:[#allocation18_spill]] %s5726_s4 }
   0x6   :  { %5773 = sst [smem:[#allocation19_spill]] %s5727_s5 }
   0x7   :  { %5774 = sst [smem:[#allocation20_spill]] %s5728_s6 }
   0x8   :  { %5775 = sst [smem:[#allocation21_spill]] %s5729_s7 }
   0x9   :  { %5776 = sst [smem:[#allocation22_spill]] %s5730_s8 }
   0xa   :  { %5777 = sst [smem:[#allocation23_spill]] %s5731_s9 }
   0xb   :  { %5778 = sst [smem:[#allocation24_spill]] %s5732_s10 }
   0xc   :  { %5779 = sst [smem:[#allocation25_spill]] %s5733_s11 }
   0xd   :  { %5780 = sst [smem:[#allocation26_spill]] %s5746_s24 }
   0xe   :  { %5781 = sst [smem:[#allocation27_spill]] %s5747_s25 }
   0xf   :  { %30 = vsyncpa [#allocation4], 0 }
  0x10   :  { %31 = vsyncpa [#allocation3], 0 }
  0x11   :  { %33 = vsyncpa [#allocation3 + $0x1], 0  ;;  %s4642_s29 = smov 0   ;;  %s4644_s2 = smov 0  }
  0x12   :  { %s4646_s6 = smov 0   ;;  %s4648_s30 = smov 0  }
  0x13 LB: > { %5782 = sst [smem:[#allocation8_spill]] %s4488_s29  ;;  %s4663_s7 = sadd.s32 4294967295, %s4500_s30   ;;  %s4500_s30 = sphi %s4648_s30, %s5816_s30   ;;  %s4496_s6 = sphi %s4646_s6, %s5821_s6   ;;  %s4492_s2 = sphi %s4644_s2, %s5820_s2   ;;  %s4488_s29 = sphi %s4642_s29, %s5819_s29  }
  0x14   : > { %5783 = sst [smem:[#allocation9_spill]] %s4496_s6  ;;  %s3854_s3 = sadd.s32 4294967294, %s4500_s30  }
  0x15   : > { %5784 = sst [smem:[#allocation10_spill]] %s4500_s30  ;;  %s4667_s26 = sadd.s32 1, %s4500_s30  }
  0x16   : > { %5785 = sst [smem:[#allocation11_spill]] %s4667_s26  ;;  %s581_s1 = sadd.s32 1, %s4496_s6 }
  0x17   : > { %s578_s8 = ssub.s32 %s4500_s30, %s4667_s26  ;;  %p591_p0 = scmp.ne.s32.totalorder %s4496_s6, %s4492_s2 }
  0x18   : > { %p579_p1 = scmp.eq.s32.totalorder %s578_s8, 0  ;;  %p592_p2 = scmp.eq.s32.totalorder %s4663_s7, 1 }
  0x19   : > { %p597_p3 = scmp.ne.s32.totalorder %s4492_s2, %s4488_s29  ;;  %p598_p4 = scmp.eq.s32.totalorder %s3854_s3, 1 }
  0x1a   : > { %s4678_s27 = scalar_select %p579_p1, %s4496_s6, %s581_s1  }
  0x1b   : > { %p4680_p5 = por %p592_p2, %p591_p0  ;;  %p4684_p6 = por %p598_p4, %p597_p3 }
  0x1c   : > { %5786 = sst [smem:[#allocation12_spill]] %s4678_s27  ;;  %p3855_p7 = scmp.ge.s32.totalorder %s4500_s30, 1 }
  0x1d   : > { %s5788_s28 = scalar_select %p4684_p6, 1, 0 }
  0x1e   : > { %p605_p8 = scmp.lt.s32.totalorder %s4500_s30, 3  ;;  %p4337_p9 = scmp.eq.s32.totalorder %s4663_s7, 0 }
  0x1f   : > { %5789 = sst [smem:[#allocation13_spill]] %s5788_s28 }
  0x20   : > { %p4691_p10 = pnand %p3855_p7, %p605_p8  ;;  %s5791_s3 = sld [smem:[#allocation14_spill]] }
  0x22   : > { %p4329_p11 = pneg %p4691_p10 }
  0x24   : > { %p4330_p12 = pnand %p4337_p9, %p4329_p11 }
  0x26   : > { %s618_s1 = sshll.u32 %s5791_s3, 4  ;;  %p4423_p0 = pneg %p4330_p12  ;;  %s619_s1 = int_to_ptr.vmem [resolvable:$true] %s618_s1 }
  0x27   : > { %s4421_s8 = scalar_lea.vmem %s619_s1, 16  ;;  %p4429_p3 = scmp.lt.s32.totalorder %s619_s1, %s619_s1 }
  0x28   : > { %p4422_p13 = scmp.ne.s32.totalorder %s619_s1, %s4421_s8  ;;  %p4430_p4 = scmp.lt.s32.totalorder %s4421_s8, %s4421_s8 }
  0x2a   : > { %p4424_p1 = pnand %p4423_p0, %p4422_p13  ;;  %p4431_p7 = por %p4430_p4, %p4429_p3 }
  0x2c   : > { %p4425_p2 = pneg %p4424_p1 }
  0x2e   : > { %p4432_p8 = pnand %p4431_p7, %p4425_p2 }
  0x30   : > { %4435 = shalt.err (!%p4432_p8)
}
  0x31   : > { %s4502_s27 = smov [#allocation2]   ;;  %711 = sbr.rel (%p4691_p10) target bundleno = 4666 (0x123a), region = 120 }
  0x32   : > { %4332 = dma.vmem_to_smem (!%p4330_p12), %s619_s1, 16, %s4502_s27, [#allocation4]  }
  0x36   : > { %4479 = dma.done.wait (%p4337_p9), [#allocation4], 16  }
  0x37   : > { %4481 = vsyncadd (%p4337_p9), [#allocation4], 4294967280 }
  0x38   : > { %717 = sfence }
  0x39   : > { %s5792_s3 = sld [smem:[#allocation17_spill]]  ;;  %p783_p11 = scmp.lt.s32.totalorder %s4663_s7, 1  ;;  %v4503_v1 = vmov 0.0   ;;  %vm4504_vm0 = vmmov 0   ;;  %vm804_vm1 = vcmask 261120   ;;  %vm1040_vm2 = vcmask 130048  }
  0x3a   : > { %4099 = vmatprep.subr.mxu0 %v4503_v1  ;;  %4107 = vmatprep.mubr.msk.f32.mxu0 %vm4504_vm0, %v4503_v1  ;;  %s5793_s28 = sld [smem:[#allocation15_spill]]  ;;  %vm1118_vm3 = vcmask 64512  }
  0x3b   : > { %s4719_s1 = scalar_select %p783_p11, %s4663_s7, 1  ;;  %4137 = vmatprep.subr.mxu1 %v4503_v1  ;;  %4139 = vmatprep.mubr.msk.f32.mxu1 %vm4504_vm0, %v4503_v1 }
  0x3c   : > { %s5794_s30 = sld [smem:[#allocation18_spill]] }
  0x3d   : > { %s5762_s0 = sshll.u32 %s4719_s1, 3  ;;  %s5796_s5 = sld [smem:[#allocation19_spill]] }
  0x3e   : > { %s5797_s27 = sld [smem:[#allocation21_spill]] }
  0x3f   : > { %v796_v0 = vld [vmem:[%s5792_s3 + $0x18] sm:$0xff]  ;;  %v795_v2 = vld [vmem:[%s5792_s3 + $0x10] sm:$0xff]  ;;  %v794_v3 = vld [vmem:[%s5792_s3 + $0x8] sm:$0xff]  ;;  %s5798_s6 = sld [smem:[#allocation20_spill]] }
  0x40   : > { %4100 = vmatpush3.msra.mxu0 %v796_v0  ;;  %v793_v4 = vld [vmem:[%s5792_s3] sm:$0xff]  ;;  %s786_s29 = scalar_lea.vmem %s5793_s28, %s5762_s0  ;;  %s5800_s8 = sld [smem:[#allocation22_spill]]  ;;  %v3875_v35 = vld [vmem:[%s5792_s3 + $0x38] sm:$0xff]  ;;  %v3874_v36 = vld [vmem:[%s5792_s3 + $0x30] sm:$0xff] }
  0x41   : > { %4101 = vmatprep.subr.mxu0 %v4503_v1  ;;  %v4738_v5 = vld [vmem:[%s786_s29] sm:$0xff]  ;;  %v3873_v37 = vld [vmem:[%s5792_s3 + $0x28] sm:$0xff]  ;;  %s5801_s29 = sld [smem:[#allocation23_spill]] }
  0x42   : > { %4102 = vmatpush3.msra.mxu0 %v795_v2  ;;  %s5795_s25 = smov %s5794_s30  ;;  %v881_v6 = vld [vmem:[%s5794_s30 + $0x18] sm:$0xff]  ;;  %v3872_v38 = vld [vmem:[%s5792_s3 + $0x20] sm:$0xff]  ;;  %s5803_s11 = sld [smem:[#allocation25_spill]] }
  0x43   : > { %4103 = vmatprep.subr.mxu0 %v4503_v1  ;;  %v880_v7 = vld [vmem:[%s5795_s25 + $0x10] sm:$0xff]  ;;  %v879_v8 = vld [vmem:[%s5795_s25 + $0x8] sm:$0xff]  ;;  %v878_v9 = vld [vmem:[%s5795_s25] sm:$0xff]  ;;  %s5805_s3 = sld [smem:[#allocation16_spill]] }
  0x44   : > { %4104 = vmatpush3.msra.mxu0 %v794_v3  ;;  %v962_v10 = vld [vmem:[%s5796_s5 + $0x18] sm:$0xff]  ;;  %v961_v11 = vld [vmem:[%s5796_s5 + $0x10] sm:$0xff]  ;;  %v960_v12 = vld [vmem:[%s5796_s5 + $0x8] sm:$0xff]  ;;  %s5806_s10 = sld [smem:[#allocation24_spill]] }
  0x45   : > { %4105 = vmatprep.subr.mxu0 %v4503_v1  ;;  %v959_v13 = vld [vmem:[%s5796_s5] sm:$0xff]  ;;  %s5799_s26 = smov %s5798_s6  ;;  %v3882_v42 = vld [vmem:[%s5795_s25 + $0x38] sm:$0xff]  ;;  %v3881_v43 = vld [vmem:[%s5795_s25 + $0x30] sm:$0xff]  ;;  %s5811_s30 = sld [smem:[#allocation26_spill]] }
  0x46   : > { %4106 = vmatpush3.msra.mxu0 %v793_v4  ;;  %v3865_v16 = vld [vmem:[%s5797_s27] ss:$0 sm:$0xff]  ;;  %v3880_v44 = vld [vmem:[%s5795_s25 + $0x28] sm:$0xff]  ;;  %v3884_v50 = vld [vmem:[%s5797_s27 + $0x1] ss:$0 sm:$0xff] }
  0x47   : > { %4108 = vmatmul.mubr.msk.f32.vlgmr.msra.gmra.mxu0 %vm804_vm1, %v4738_v5  ;;  %4110 = vmatprep.subr.mxu0 %v4503_v1  ;;  %v3863_v18 = vld [vmem:[%s5798_s6] ss:$0 sm:$0xff]  ;;  %v3877_v51 = vld [vmem:[%s5799_s26 + $0x1] ss:$0 sm:$0xff]  ;;  %v3889_v56 = vld [vmem:[%s5796_s5 + $0x38] sm:$0xff]  ;;  %s5802_s24 = smov %s5801_s29  ;;  %s1773_s6 = sld [smem:[#allocation2]] }
  0x48   : > { %4111 = vmatpush3.msra.mxu0 %v881_v6  ;;  %4118 = vmatprep.mubr.msk.f32.mxu0 %vm4504_vm0, %v4503_v1  ;;  %v3867_v22 = vld [vmem:[%s5800_s8] ss:$0 sm:$0xff]  ;;  %v3888_v57 = vld [vmem:[%s5796_s5 + $0x30] sm:$0xff]  ;;  %v3887_v58 = vld [vmem:[%s5796_s5 + $0x28] sm:$0xff] }
  0x49   : > { %4112 = vmatprep.subr.mxu0 %v4503_v1  ;;  %v3879_v45 = vld [vmem:[%s5795_s25 + $0x20] sm:$0xff]  ;;  %s3901_s25 = sld [smem:[#allocation2 + $0x1]] }
  0x4a   : > { %4113 = vmatpush3.msra.mxu0 %v880_v7  ;;  %v3886_v59 = vld [vmem:[%s5796_s5 + $0x20] sm:$0xff]  ;;  %s3962_s5 = sld [smem:[#allocation2 + $0x7]] }
  0x4b   : > { %4114 = vmatprep.subr.mxu0 %v4503_v1  ;;  %v3891_v7 = vld [vmem:[%s5800_s8 + $0x1] ss:$0 sm:$0xff]  ;;  %s5812_s8 = sld [smem:[#allocation27_spill]] }
  0x4c   : > { %4115 = vmatpush3.msra.mxu0 %v879_v8 }
  0x4d   : > { %4116 = vmatprep.subr.mxu0 %v4503_v1 }
  0x4e   : > { %4117 = vmatpush3.msra.mxu0 %v878_v9 }
  0x4f   : > { %4119 = vmatmul.mubr.msk.f32.vlgmr.msra.gmra.mxu0 %vm804_vm1, %v4738_v5  ;;  %4121 = vmatprep.subr.mxu0 %v4503_v1 }
  0x50   : > { %4129 = vmatprep.mubr.msk.f32.mxu0 %vm4504_vm0, %v4503_v1  ;;  %4122 = vmatpush3.msra.mxu0 %v962_v10 }
  0x51   : > { %4123 = vmatprep.subr.mxu0 %v4503_v1 }
  0x52   : > { %4124 = vmatpush3.msra.mxu0 %v961_v11  ;;  %v3897_v11 = vld [vmem:[%s5801_s29 + $0x18] sm:$0xff]  ;;  %s5804_s29 = sshll.u32 %s4719_s1, 3  ;;  %s3961_s1 = sld [smem:[#allocation2 + $0x6]] }
  0x53   : > { %4125 = vmatprep.subr.mxu0 %v4503_v1  ;;  %s790_s28 = scalar_lea.vmem %s5805_s3, %s5804_s29  ;;  %s3973_s3 = sshll.u32 %s4663_s7, 7 }
  0x54   : > { %4126 = vmatpush3.msra.mxu0 %v960_v12  ;;  %s4511_s29 = smov [#allocation5]  }
  0x55   : > { %4127 = vmatprep.subr.mxu0 %v4503_v1  ;;  %s4440_s7 = sshll.u32 %s4511_s29, 4  ;;  %s4441_s7 = int_to_ptr.vmem [resolvable:$false] %s4440_s7 }
  0x56   : > { %4128 = vmatpush3.msra.mxu0 %v959_v13 }
  0x57   : > { %4130 = vmatmul.mubr.msk.f32.vlgmr.msra.gmra.mxu0 %vm804_vm1, %v4738_v5  ;;  %4132 = vmatprep.subr.mxu0 %v4503_v1 }
  0x58   : > { %4134 = vmatprep.mubr.msk.f32.mxu0 %vm4504_vm0, %v4503_v1 }
 0x107   : > { %v874_v14 = vpop.f32.mrf.mxu0 }
 0x108   : > { %v875_v21 = vadd.f32 %v3863_v18, %v874_v14 }
 0x109   : > { %v4109_v15 = vpop.f32.mrf.mxu0 }
 0x10a   : > { %v1204_v15 = vld [vmem:[%s5802_s24 + $0x8] sm:$0xff] }
 0x10f   : > { %v955_v17 = vpop.f32.mrf.mxu0 }
 0x110   : > { %v956_v19 = vadd.f32 %v3865_v16, %v955_v17  ;;  %v1203_v16 = vld [vmem:[%s5802_s24] sm:$0xff]  ;;  %v3896_v17 = vld [vmem:[%s5802_s24 + $0x10] sm:$0xff] }
 0x111   : > { %v4120_v20 = vpop.f32.mrf.mxu0 }
 0x112   : > { %4133 = vmatpush3.xpose.msk.msra.mxu0 %vm1040_vm2, %v956_v19 }
 0x113   : > { %4142 = vmatprep.subr.mxu0 %v4503_v1 }
 0x115   : > { %4135 = vmatmul.mubr.msk.f32.vlgmr.msra.gmra.mxu0 %vm1040_vm2, %v875_v21 }
 0x116   : > { %4150 = vmatprep.mubr.msk.f32.mxu0 %vm4504_vm0, %v4503_v1  ;;  %4143 = vmatpush3.msra.mxu0 %v3875_v35 }
 0x117   : > { %v1036_v23 = vpop.f32.mrf.mxu0  ;;  %4144 = vmatprep.subr.mxu0 %v4503_v1 }
 0x118   : > { %v1037_v24 = vadd.f32 %v3867_v22, %v1036_v23  ;;  %4145 = vmatpush3.msra.mxu0 %v3874_v36  ;;  %v1970_v22 = vld [vmem:[%s5734_s12 + $0x18] sm:$0xff]  ;;  %v1969_v23 = vld [vmem:[%s5734_s12 + $0x10] sm:$0xff]  ;;  %v1775_v36 = vstv %s3901_s25  ;;  %s3945_s25 = sld [smem:[#allocation2 + $0x3]] }
 0x119   : > { %v4131_v25 = vpop.f32.mrf.mxu0  ;;  %4146 = vmatprep.subr.mxu0 %v4503_v1 }
 0x11a   : > { %4138 = vmatpush3.msra.mxu1 %v1037_v24  ;;  %4147 = vmatpush3.msra.mxu0 %v3873_v37  ;;  %v1886_v24 = vld [vmem:[%s5803_s11 + $0x18] sm:$0xff]  ;;  %v1885_v25 = vld [vmem:[%s5803_s11 + $0x10] sm:$0xff] }
 0x11b   : > { %4153 = vmatprep.subr.mxu1 %v4503_v1  ;;  %4148 = vmatprep.subr.mxu0 %v4503_v1 }
 0x11c   : > { %4149 = vmatpush3.msra.mxu0 %v3872_v38 }
 0x11d   : > { %4151 = vmatmul.mubr.msk.f32.vlgmr.msra.gmra.mxu0 %vm804_vm1, %v4738_v5  ;;  %4164 = vmatprep.subr.mxu0 %v4503_v1 }
 0x11e   : > { %4172 = vmatprep.mubr.msk.f32.mxu0 %vm4504_vm0, %v4503_v1  ;;  %4165 = vmatpush3.msra.mxu0 %v3889_v56  ;;  %v4508_v56 = vmov 2102212464  }
 0x11f   : > { %4166 = vmatprep.subr.mxu0 %v4503_v1 }
 0x120   : > { %4167 = vmatpush3.msra.mxu0 %v3888_v57 }
 0x121   : > { %4168 = vmatprep.subr.mxu0 %v4503_v1 }
 0x122   : > { %4169 = vmatpush3.msra.mxu0 %v3887_v58 }
 0x123   : > { %4170 = vmatprep.subr.mxu0 %v4503_v1 }
 0x124   : > { %4171 = vmatpush3.msra.mxu0 %v3886_v59  ;;  %v4509_v59 = vmov 920167782  }
 0x125   : > { %4173 = vmatmul.mubr.msk.f32.vlgmr.msra.gmra.mxu0 %vm804_vm1, %v4738_v5  ;;  %4185 = vmatprep.subr.mxu0 %v4503_v1 }
 0x126   : > { %4189 = vmatprep.mubr.msk.f32.mxu0 %vm4504_vm0, %v4503_v1  ;;  %4186 = vmatpush3.msra.mxu0 %v3897_v11 }
 0x127   : > { %4187 = vmatprep.subr.mxu0 %v4503_v1 }
 0x128   : > { %4188 = vmatpush3.msra.mxu0 %v3896_v17 }
 0x129   : > { %4199 = vmatprep.subr.mxu0 %v4503_v1 }
 0x1d5   : > { %v1113_v26 = vpop.f32.mrf.mxu0 }
 0x1d6   : > { %v1117_v27 = vmul.f32 0.25, %v1113_v26  ;;  %v1968_v26 = vld [vmem:[%s5734_s12 + $0x8] sm:$0xff] }
 0x1d7   : > { %v4136_v28 = vpop.f32.mrf.mxu0 }
 0x1d8   : > { %v1119_v29 = vsel %vm1118_vm3, %v1117_v27, -inf  ;;  %v1967_v28 = vld [vmem:[%s5734_s12] sm:$0xff] }
 0x1d9   : > { %1120 = vmax.xlane.f32.xlu0 %v1119_v29  ;;  %v1883_v29 = vld [vmem:[%s5803_s11] sm:$0xff] }
 0x1dd   : > { %v1284_v46 = vpop.f32.mrf.mxu0 }
 0x1de   : > { %v1285_v54 = vadd.f32 %v3877_v51, %v1284_v46 }
 0x1df   : > { %v4152_v47 = vpop.f32.mrf.mxu0 }
 0x1e5   : > { %v1450_v8 = vpop.f32.mrf.mxu0 }
 0x1e6   : > { %v1451_v9 = vadd.f32 %v3891_v7, %v1450_v8 }
 0x1e7   : > { %v4174_v10 = vpop.f32.mrf.mxu0 }
 0x262   : > { %v1121_v30 = vpop.xlane.xlu0 %1120 }
 0x263   : > { %v1122_v31 = vsub.f32 %v1117_v27, %v1121_v30  ;;  %v1884_v27 = vld [vmem:[%s5803_s11 + $0x8] sm:$0xff]  ;;  %v4941_v30 = vld [vmem:[%s790_s28] sm:$0xff] }
 0x265   : > { %v1123_v32 = vmul.f32 1.442695, %v1122_v31 }
 0x267   : > { %4381 = vpow2.f32 %v1123_v32  ;;  %v3900_v32 = vld [vmem:[%s5806_s10] ss:$0 sm:$0xff] }
 0x274   : > { %v4382_v33 = vpop.eup %4381 }
 0x275   : > { %v1125_v34 = vsel %vm1118_vm3, %v4382_v33, 0.0 }
 0x276   : > { %1126 = vadd.xlane.f32.xlu0 %v1125_v34 }
 0x2ff   : > { %v1127_v39 = vpop.xlane.xlu0 %1126 }
 0x300   : > { %4383 = vrcp.f32 %v1127_v39 }
 0x30d   : > { %v4384_v40 = vpop.eup %4383 }
 0x30e   : > { %v1129_v41 = vmul.f32 %v4384_v40, %v4382_v33 }
 0x310   : > { %4140 = vmatmul.mubr.msk.f32.vlgmr.msra.gmra.mxu1 %vm1118_vm3, %v1129_v41 }
 0x311   : > { %4154 = vmatpush3.msra.mxu1 %v3882_v42  ;;  %4161 = vmatprep.mubr.msk.f32.mxu1 %vm4504_vm0, %v4503_v1 }
 0x312   : > { %4155 = vmatprep.subr.mxu1 %v4503_v1 }
 0x313   : > { %4156 = vmatpush3.msra.mxu1 %v3881_v43 }
 0x314   : > { %4157 = vmatprep.subr.mxu1 %v4503_v1 }
 0x315   : > { %4158 = vmatpush3.msra.mxu1 %v3880_v44 }
 0x316   : > { %4159 = vmatprep.subr.mxu1 %v4503_v1 }
 0x317   : > { %4160 = vmatpush3.msra.mxu1 %v3879_v45 }
 0x318   : > { %4162 = vmatmul.mubr.msk.f32.vlgmr.msra.gmra.mxu1 %vm804_vm1, %v4738_v5  ;;  %4175 = vmatprep.subr.mxu1 %v4503_v1 }
 0x319   : > { %4177 = vmatprep.mubr.msk.f32.mxu1 %vm4504_vm0, %v4503_v1 }
 0x3d0   : > { %v1199_v48 = vpop.f32.mrf.mxu1 }
 0x3d2   : > { %v4141_v49 = vpop.f32.mrf.mxu1 }
 0x3d8   : > { %v1367_v52 = vpop.f32.mrf.mxu1 }
 0x3d9   : > { %v1368_v53 = vadd.f32 %v3884_v50, %v1367_v52  ;;  %v4506_v50 = vmov 2475754826  }
 0x3da   : > { %v4163_v55 = vpop.f32.mrf.mxu1 }
 0x3db   : > { %4176 = vmatpush3.xpose.msk.msra.mxu1 %vm1040_vm2, %v1368_v53  ;;  %v4507_v53 = vmov 2131351028  }
 0x3dc   : > { %4180 = vmatprep.subr.mxu1 %v4503_v1 }
 0x3de   : > { %4178 = vmatmul.mubr.msk.f32.vlgmr.msra.gmra.mxu1 %vm1040_vm2, %v1285_v54 }
 0x3df   : > { %4182 = vmatprep.mubr.msk.f32.mxu1 %vm4504_vm0, %v4503_v1  ;;  %4181 = vmatpush3.msra.mxu1 %v1451_v9 }
 0x3e0   : > { %4192 = vmatprep.subr.mxu1 %v4503_v1 }
 0x49e   : > { %v1526_v60 = vpop.f32.mrf.mxu1 }
 0x49f   : > { %v1530_v61 = vmul.f32 0.25, %v1526_v60 }
 0x4a0   : > { %v4179_v62 = vpop.f32.mrf.mxu1 }
 0x4a1   : > { %v1531_v63 = vsel %vm1118_vm3, %v1530_v61, -inf  ;;  %v4510_v62 = vmov 1326507024  }
 0x4a2   : > { %1532 = vmax.xlane.f32.xlu1 %v1531_v63 }
 0x52b   : > { %v1533_v0 = vpop.xlane.xlu1 %1532 }
 0x52c   : > { %v1534_v2 = vsub.f32 %v1530_v61, %v1533_v0 }
 0x52e   : > { %v1535_v3 = vmul.f32 1.442695, %v1534_v2 }
 0x530   : > { %4385 = vpow2.f32 %v1535_v3 }
 0x53d   : > { %v4386_v4 = vpop.eup %4385 }
 0x53e   : > { %v1537_v6 = vsel %vm1118_vm3, %v4386_v4, 0.0 }
 0x53f   : > { %1538 = vadd.xlane.f32.xlu1 %v1537_v6 }
 0x5c8   : > { %v1539_v12 = vpop.xlane.xlu1 %1538 }
 0x5c9   : > { %4387 = vrcp.f32 %v1539_v12 }
 0x5d6   : > { %v4388_v13 = vpop.eup %4387 }
 0x5d7   : > { %v1541_v14 = vmul.f32 %v4388_v13, %v4386_v4 }
 0x5d9   : > { %4183 = vmatmul.mubr.msk.f32.vlgmr.msra.gmra.mxu1 %vm1118_vm3, %v1541_v14 }
 0x5da   : > { %4193 = vmatpush3.msra.mxu1 %v1204_v15  ;;  %4196 = vmatprep.mubr.msk.f32.mxu1 %vm4504_vm0, %v4503_v1 }
 0x5db   : > { %4194 = vmatprep.subr.mxu1 %v4503_v1 }
 0x5dc   : > { %4195 = vmatpush3.msra.mxu1 %v1203_v16 }
 0x5dd   : > { %4197 = vmatmul.mubr.msk.f32.vlgmr.msra.gmra.mxu1 %vm1040_vm2, %v1199_v48  ;;  %4210 = vmatprep.subr.mxu1 %v4503_v1 }
 0x5de   : > { %4218 = vmatprep.mubr.msk.f32.mxu1 %vm4504_vm0, %v4503_v1  ;;  %4211 = vmatpush3.msra.mxu1 %v1970_v22 }
 0x5df   : > { %4212 = vmatprep.subr.mxu1 %v4503_v1 }
 0x5e0   : > { %4213 = vmatpush3.msra.mxu1 %v1969_v23 }
 0x5e1   : > { %4214 = vmatprep.subr.mxu1 %v4503_v1 }
 0x5e2   : > { %4215 = vmatpush3.msra.mxu1 %v1968_v26 }
 0x5e3   : > { %4216 = vmatprep.subr.mxu1 %v4503_v1 }
 0x5e4   : > { %4217 = vmatpush3.msra.mxu1 %v1967_v28 }
 0x5e5   : > { %4219 = vmatmul.mubr.msk.f32.vlgmr.msra.gmra.mxu1 %vm804_vm1, %v4941_v30  ;;  %4232 = vmatprep.subr.mxu1 %v4503_v1 }
 0x5e6   : > { %4234 = vmatprep.mubr.msk.f32.mxu1 %vm4504_vm0, %v4503_v1 }
 0x699   : > { %v1611_v18 = vpop.f32.mrf.mxu1 }
 0x69a   : > { %4190 = vmatmul.mubr.msk.f32.vlgmr.msra.gmra.mxu0 %vm1040_vm2, %v1611_v18 }
 0x69b   : > { %v4184_v19 = vpop.f32.mrf.mxu1  ;;  %4207 = vmatprep.mubr.msk.f32.mxu0 %vm4504_vm0, %v4503_v1  ;;  %4200 = vmatpush3.msra.mxu0 %v1886_v24 }
 0x69c   : > { %4201 = vmatprep.subr.mxu0 %v4503_v1 }
 0x69d   : > { %v1760_v20 = vpop.f32.mrf.mxu1  ;;  %4202 = vmatpush3.msra.mxu0 %v1885_v25 }
 0x69e   : > { %4203 = vmatprep.subr.mxu0 %v4503_v1 }
 0x69f   : > { %v4198_v21 = vpop.f32.mrf.mxu1  ;;  %4204 = vmatpush3.msra.mxu0 %v1884_v27 }
 0x6a0   : > { %4205 = vmatprep.subr.mxu0 %v4503_v1 }
 0x6a1   : > { %4206 = vmatpush3.msra.mxu0 %v1883_v29 }
 0x6a2   : > { %4221 = vmatprep.subr.mxu0 %v4503_v1 }
 0x75a   : > { %v1687_v31 = vpop.f32.mrf.mxu0 }
 0x75b   : > { %v1761_v33 = vadd.f32 %v1760_v20, %v1687_v31 }
 0x75c   : > { %v4191_v34 = vpop.f32.mrf.mxu0 }
 0x75d   : > { %v1771_v35 = vadd.f32 %v3900_v32, %v1761_v33 }
 0x75f   : > { %v4955_v37 = vadd.f32 %v1771_v35, %v4738_v5  ;;  %v4505_v5 = vmov 683565275  }
 0x761   : > { %v4958_v38 = vadd.f32 %v1775_v36, %v4955_v37 }
 0x763   : > { %v1780_v39 = vand.u32 2139095040, %v4958_v38  ;;  %v1777_v43 = vand.u32 2147483647, %v4958_v38  ;;  %vm1779_vm11 = vcmp.lt.s32.totalorder %v4958_v38, 0 }
 0x765   : > { %v1781_v40 = vshrl.u32 %v1780_v39, 23  ;;  %v1784_v46 = vand.u32 8388607, %v1777_v43  ;;  %vm1778_vm12 = vcmp.le.f32.partialorder %v1777_v43, 0.7853982  ;;  %v1881_v43 = vstv %s1773_s6  ;;  %s3944_s6 = sld [smem:[#allocation2 + $0x2]] }
 0x767   : > { %v3902_v41 = vadd.s32 4294967169, %v1781_v40  ;;  %v1785_v0 = vor.u32 8388608, %v1784_v46 }
 0x769   : > { %v1787_v42 = vadd.s32 1, %v3902_v41  ;;  %v1825_v16 = vshll.u32 %v1785_v0, 8 }
 0x76b   : > { %vm1788_vm4 = vcmp.gt.s32.totalorder %v1787_v42, 0 }
 0x76c   : > { %v1789_v44 = vsel %vm1788_vm4, %v1787_v42, 0  ;;  %vm1869_vm4 = vweird.f32 %v4958_v38 }
 0x76d   : > { %v1791_v45 = vand.u32 31, %v1789_v44  ;;  %v1790_v48 = vshrl.u32 %v1789_v44, 5 }
 0x76f   : > { %v1792_v47 = vsub.s32 32, %v1791_v45  ;;  %v1794_v49 = vshll.u32 %v4505_v5, %v1791_v45  ;;  %v1797_v51 = vshll.u32 %v4506_v50, %v1791_v45  ;;  %v1800_v55 = vshll.u32 %v4507_v53, %v1791_v45 }
 0x770   : > { %v1803_v58 = vshll.u32 %v4508_v56, %v1791_v45  ;;  %v1806_v61 = vshll.u32 %v4509_v59, %v1791_v45  ;;  %vm1809_vm5 = vcmp.lt.s32.totalorder %v1790_v48, 1  ;;  %vm1812_vm6 = vcmp.lt.s32.totalorder %v1790_v48, 4 }
 0x771   : > { %v1795_v52 = vshrl.u32 %v4506_v50, %v1792_v47  ;;  %v1798_v54 = vshrl.u32 %v4507_v53, %v1792_v47  ;;  %v1801_v57 = vshrl.u32 %v4508_v56, %v1792_v47  ;;  %v1804_v60 = vshrl.u32 %v4509_v59, %v1792_v47 }
 0x772   : > { %v1807_v63 = vshrl.u32 %v4510_v62, %v1792_v47  ;;  %v1793_v11 = vshrl.u32 %v4505_v5, %v1792_v47  ;;  %vm1811_vm7 = vcmp.lt.s32.totalorder %v1790_v48, 3  ;;  %vm1810_vm8 = vcmp.lt.s32.totalorder %v1790_v48, 2 }
 0x773   : > { %v1796_v2 = vor.u32 %v1795_v52, %v1794_v49  ;;  %v1799_v3 = vor.u32 %v1798_v54, %v1797_v51  ;;  %v1802_v4 = vor.u32 %v1801_v57, %v1800_v55  ;;  %v1805_v6 = vor.u32 %v1804_v60, %v1803_v58 }
 0x774   : > { %v1808_v7 = vor.u32 %v1807_v63, %v1806_v61 }
 0x775   : > { %v1814_v8 = vsel %vm1812_vm6, %v1802_v4, 2102212464  ;;  %v1817_v9 = vsel %vm1809_vm5, %v1796_v2, %v1799_v3  ;;  %v1821_v10 = vsel %vm1809_vm5, %v1799_v3, %v1802_v4  ;;  %v1818_v12 = vsel %vm1812_vm6, %v1805_v6, 920167782 }
 0x776   : > { %v1822_v13 = vsel %vm1812_vm6, %v1808_v7, 1326507024  ;;  %v1819_v14 = vsel %vm1811_vm7, %v1802_v4, %v1818_v12  ;;  %v1813_v17 = vsel %vm1809_vm5, %v1793_v11, %v1796_v2  ;;  %v1815_v18 = vsel %vm1811_vm7, %v1799_v3, %v1814_v8 }
 0x777   : > { %v1823_v15 = vsel %vm1811_vm7, %v1805_v6, %v1822_v13  ;;  %v1820_v19 = vsel %vm1810_vm8, %v1817_v9, %v1819_v14  ;;  %v1816_v25 = vsel %vm1810_vm8, %v1813_v17, %v1815_v18  ;;  %v2051_v17 = vld [vmem:[%s5735_s13] sm:$0xff]  ;;  %v3918_v18 = vld [vmem:[%s5803_s11 + $0x38] sm:$0xff] }
 0x778   : > { %v1824_v20 = vsel %vm1810_vm8, %v1821_v10, %v1823_v15  ;;  %v4978_v23 = vmul.u32.u64.low %v1825_v16, %v1820_v19  ;;  %v4979_v24 = vmul.u32.u64.high %v1825_v16, %v1820_v19, %v4978_v23  ;;  %v1832_v27 = vmul.u32 %v1825_v16, %v1816_v25  ;;  %v2054_v15 = vld [vmem:[%s5735_s13 + $0x18] sm:$0xff]  ;;  %v3917_v19 = vld [vmem:[%s5803_s11 + $0x30] sm:$0xff] }
 0x779   : > { %v4975_v21 = vmul.u32.u64.low %v1825_v16, %v1824_v20  ;;  %v4976_v22 = vmul.u32.u64.high %v1825_v16, %v1824_v20, %v4975_v21  ;;  %v2053_v16 = vld [vmem:[%s5735_s13 + $0x10] sm:$0xff]  ;;  %v3916_v20 = vld [vmem:[%s5803_s11 + $0x28] sm:$0xff] }
 0x77a   : > { %v1835_v26 = vadd.s32 1, %v4979_v24  ;;  %v3915_v21 = vld [vmem:[%s5803_s11 + $0x20] sm:$0xff] }
 0x77b   : > { %vm1834_vm9 = vc.u32 %v4976_v22, %v4978_v23  ;;  %v1833_v42 = vadd.s32 %v4978_v23, %v4976_v22  ;;  %v3908_v22 = vld [vmem:[%s5737_s15] ss:$0 sm:$0xff]  ;;  %v2047_v23 = vpop.f32.mrf.mxu1 }
 0x77c   : > { %v1836_v28 = vsel %vm1834_vm9, %v1835_v26, %v4979_v24  ;;  %v2048_v24 = vadd.f32 %v3908_v22, %v2047_v23  ;;  %v3906_v26 = vld [vmem:[%s5736_s14] ss:$0 sm:$0xff] }
 0x77d   : > { %v1837_v29 = vadd.s32 %v1836_v28, %v1832_v27  ;;  %v4220_v25 = vpop.f32.mrf.mxu1 }
 0x77e   : > { %4233 = vmatpush3.xpose.msk.msra.mxu1 %vm1040_vm2, %v2048_v24  ;;  %v2294_v25 = vld [vmem:[%s5739_s17 + $0x8] sm:$0xff] }
 0x77f   : > { %v1838_v31 = vadd.s32 536870912, %v1837_v29  ;;  %4237 = vmatprep.subr.mxu1 %v4503_v1 }
 0x781   : > { %v1839_v32 = vshrl.u32 %v1838_v31, 30  ;;  %v3910_v31 = vld [vmem:[%s5738_s16] ss:$0 sm:$0xff] }
 0x783   : > { %v1840_v33 = vshll.u32 %v1839_v32, 30  ;;  %v1863_v60 = vsub.s32 4, %v1839_v32 }
 0x785   : > { %v1841_v34 = vsub.s32 %v1837_v29, %v1840_v33  ;;  %v1864_v0 = vsel %vm1779_vm11, %v1863_v60, %v1839_v32 }
 0x786   : > { %v1866_v2 = vsel %vm1778_vm12, 0, %v1864_v0 }
 0x787   : > { %v1843_v35 = vsub.s32 0, %v1841_v34  ;;  %v1870_v3 = vadd.s32 3, %v1866_v2  ;;  %v3920_v2 = vld [vmem:[%s5736_s14 + $0x1] ss:$0 sm:$0xff] }
 0x789   : > { %v3903_v36 = vmin.u32 %v1843_v35, %v1841_v34  ;;  %v1871_v4 = vand.u32 3, %v1870_v3 }
 0x78b   : > { %v1845_v39 = vclz %v3903_v36  ;;  %vm1876_vm13 = vcmp.eq.s32.totalorder %v1871_v4, 2  ;;  %vm1873_vm14 = vcmp.eq.s32.totalorder %v1871_v4, 0  ;;  %vm1872_vm15 = vcmp.lt.s32.totalorder %v1871_v4, 2 }
 0x78d   : > { %v3904_v40 = vadd.s32 4294967294, %v1845_v39 }
 0x78f   : > { %vm3905_vm10 = vcmp.lt.s32.totalorder %v3904_v40, 0 }
 0x790   : > { %v1848_v41 = vsel %vm3905_vm10, 0, %v3904_v40 }
 0x791   : > { %v1849_v44 = vsub.s32 32, %v1848_v41  ;;  %v1853_v45 = vsub.s32 4294967266, %v1848_v41  ;;  %v1850_v46 = vshll.u32 %v1841_v34, %v1848_v41 }
 0x793   : > { %v1851_v47 = vshrl.u32 %v1833_v42, %v1849_v44  ;;  %v1854_v48 = vadd.s32 127, %v1853_v45 }
 0x795   : > { %v1852_v49 = vor.u32 %v1851_v47, %v1850_v46  ;;  %v1855_v51 = vshll.u32 %v1854_v48, 23 }
 0x797   : > { %v1856_v52 = vor.u32 4788187, %v1855_v51  ;;  %v1859_v55 = vcvt.s32.f32 %v1852_v49 }
 0x799   : > { %v1857_v54 = vand.u32 2147483647, %v1856_v52 }
 0x79b   : > { %v1860_v57 = vmul.f32 %v1859_v55, %v1857_v54  ;;  %v3925_v54 = vld [vmem:[%s5734_s12 + $0x38] sm:$0xff]  ;;  %v3924_v55 = vld [vmem:[%s5734_s12 + $0x30] sm:$0xff] }
 0x79d   : > { %v1861_v58 = vxor.u32 2147483648, %v1860_v57 }
 0x79f   : > { %v1862_v61 = vsel %vm1779_vm11, %v1861_v58, %v1860_v57  ;;  %v3923_v57 = vld [vmem:[%s5734_s12 + $0x28] sm:$0xff]  ;;  %v3922_v58 = vld [vmem:[%s5734_s12 + $0x20] sm:$0xff] }
 0x7a0   : > { %v1865_v63 = vsel %vm1778_vm12, %v4958_v38, %v1862_v61  ;;  %v2052_v38 = vld [vmem:[%s5735_s13 + $0x8] sm:$0xff] }
 0x7a1   : > { %4389 = vcosq.f32 %v1865_v63 }
 0x7a2   : > { %4391 = vsinq.f32 %v1865_v63  ;;  %v3927_v63 = vld [vmem:[%s5737_s15 + $0x1] ss:$0 sm:$0xff] }
 0x7ae   : > { %v4390_v6 = vpop.eup %4389 }
 0x7af   : > { %v4392_v7 = vpop.eup %4391  ;;  %v1877_v8 = vxor.u32 2147483648, %v4390_v6 }
 0x7b0   : > { %v1874_v9 = vxor.u32 2147483648, %v4392_v7 }
 0x7b1   : > { %v1878_v10 = vsel %vm1876_vm13, %v1877_v8, %v4392_v7  ;;  %v3932_v7 = vld [vmem:[%s5735_s13 + $0x38] sm:$0xff]  ;;  %v3931_v8 = vld [vmem:[%s5735_s13 + $0x30] sm:$0xff] }
 0x7b2   : > { %v1875_v11 = vsel %vm1873_vm14, %v4390_v6, %v1874_v9  ;;  %v3930_v9 = vld [vmem:[%s5735_s13 + $0x28] sm:$0xff] }
 0x7b3   : > { %v1879_v12 = vsel %vm1872_vm15, %v1875_v11, %v1878_v10  ;;  %v3929_v10 = vld [vmem:[%s5735_s13 + $0x20] sm:$0xff] }
 0x7b4   : > { %v1880_v13 = vsel %vm1869_vm4, nan, %v1879_v12 }
 0x7b5   : > { %v1882_v14 = vmul.f32 %v1881_v43, %v1880_v13 }
 0x7b7   : > { %4208 = vmatmul.mubr.msk.f32.vlgmr.msra.gmra.mxu0 %vm804_vm1, %v1882_v14 }
 0x7b8   : > { %4222 = vmatpush3.msra.mxu0 %v2054_v15  ;;  %4229 = vmatprep.mubr.msk.f32.mxu0 %vm4504_vm0, %v4503_v1 }
 0x7b9   : > { %4223 = vmatprep.subr.mxu0 %v4503_v1 }
 0x7ba   : > { %4224 = vmatpush3.msra.mxu0 %v2053_v16 }
 0x7bb   : > { %4225 = vmatprep.subr.mxu0 %v4503_v1 }
 0x7bc   : > { %4226 = vmatpush3.msra.mxu0 %v2052_v38 }
 0x7bd   : > { %4227 = vmatprep.subr.mxu0 %v4503_v1 }
 0x7be   : > { %4228 = vmatpush3.msra.mxu0 %v2051_v17 }
 0x7bf   : > { %4242 = vmatprep.subr.mxu0 %v4503_v1  ;;  %4230 = vmatmul.mubr.msk.f32.vlgmr.msra.gmra.mxu0 %vm804_vm1, %v4941_v30 }
 0x7c0   : > { %4243 = vmatpush3.msra.mxu0 %v3918_v18  ;;  %4250 = vmatprep.mubr.msk.f32.mxu0 %vm4504_vm0, %v4503_v1 }
 0x7c1   : > { %4244 = vmatprep.subr.mxu0 %v4503_v1 }
 0x7c2   : > { %4245 = vmatpush3.msra.mxu0 %v3917_v19 }
 0x7c3   : > { %4246 = vmatprep.subr.mxu0 %v4503_v1 }
 0x7c4   : > { %4247 = vmatpush3.msra.mxu0 %v3916_v20 }
 0x7c5   : > { %4248 = vmatprep.subr.mxu0 %v4503_v1 }
 0x7c6   : > { %4249 = vmatpush3.msra.mxu0 %v3915_v21  ;;  %v3940_v21 = vld [vmem:[%s5739_s17 + $0x18] sm:$0xff] }
 0x7c7   : > { %4251 = vmatmul.mubr.msk.f32.vlgmr.msra.gmra.mxu0 %vm804_vm1, %v1882_v14  ;;  %4264 = vmatprep.subr.mxu0 %v4503_v1 }
 0x7c8   : > { %4272 = vmatprep.mubr.msk.f32.mxu0 %vm4504_vm0, %v4503_v1  ;;  %4265 = vmatpush3.msra.mxu0 %v3932_v7 }
 0x7c9   : > { %4266 = vmatprep.subr.mxu0 %v4503_v1 }
 0x7ca   : > { %4267 = vmatpush3.msra.mxu0 %v3931_v8 }
 0x7cb   : > { %4268 = vmatprep.subr.mxu0 %v4503_v1 }
 0x7cc   : > { %4269 = vmatpush3.msra.mxu0 %v3930_v9 }
 0x7cd   : > { %4270 = vmatprep.subr.mxu0 %v4503_v1 }
 0x7ce   : > { %4271 = vmatpush3.msra.mxu0 %v3929_v10 }
 0x7cf   : > { %4273 = vmatmul.mubr.msk.f32.vlgmr.msra.gmra.mxu0 %vm804_vm1, %v4941_v30  ;;  %4285 = vmatprep.subr.mxu0 %v4503_v1 }
 0x7d0   : > { %4289 = vmatprep.mubr.msk.f32.mxu0 %vm4504_vm0, %v4503_v1  ;;  %4286 = vmatpush3.msra.mxu0 %v3940_v21 }
 0x7d1   : > { %4287 = vmatprep.subr.mxu0 %v4503_v1 }
 0x877   : > { %v1963_v27 = vpop.f32.mrf.mxu0 }
 0x878   : > { %v1964_v28 = vadd.f32 %v3906_v26, %v1963_v27  ;;  %v2293_v26 = vld [vmem:[%s5739_s17] sm:$0xff]  ;;  %v3939_v27 = vld [vmem:[%s5739_s17 + $0x10] sm:$0xff] }
 0x879   : > { %v4209_v29 = vpop.f32.mrf.mxu0  ;;  %4288 = vmatpush3.msra.mxu0 %v3939_v27 }
 0x87a   : > { %4235 = vmatmul.mubr.msk.f32.vlgmr.msra.gmra.mxu1 %vm1040_vm2, %v1964_v28 }
 0x87b   : > { %4239 = vmatprep.mubr.msk.f32.mxu1 %vm4504_vm0, %v4503_v1 }
 0x87f   : > { %v2128_v32 = vpop.f32.mrf.mxu0 }
 0x880   : > { %v2129_v33 = vadd.f32 %v3910_v31, %v2128_v32 }
 0x881   : > { %v4231_v34 = vpop.f32.mrf.mxu0 }
 0x882   : > { %4238 = vmatpush3.msra.mxu1 %v2129_v33  ;;  %v2980_v33 = vld [vmem:[%s5741_s19 + $0x38] sm:$0xff]  ;;  %v2979_v34 = vld [vmem:[%s5741_s19 + $0x30] sm:$0xff] }
 0x883   : > { %4253 = vmatprep.subr.mxu1 %v4503_v1  ;;  %3020 = vmatprep.subr.mxu0 %v2980_v33 }
 0x887   : > { %v2374_v35 = vpop.f32.mrf.mxu0 }
 0x888   : > { %v2375_v6 = vadd.f32 %v3920_v2, %v2374_v35  ;;  %v2978_v35 = vld [vmem:[%s5741_s19 + $0x28] sm:$0xff] }
 0x889   : > { %v4252_v36 = vpop.f32.mrf.mxu0 }
 0x88a   : > { %v2977_v36 = vld [vmem:[%s5741_s19 + $0x20] sm:$0xff] }
 0x88f   : > { %v2540_v18 = vpop.f32.mrf.mxu0 }
 0x891   : > { %v4274_v20 = vpop.f32.mrf.mxu0 }
 0x93a   : > { %v2204_v39 = vpop.f32.mrf.mxu1 }
 0x93b   : > { %v2208_v40 = vmul.f32 0.25, %v2204_v39  ;;  %v2975_v39 = vld [vmem:[%s5741_s19 + $0x10] sm:$0xff] }
 0x93c   : > { %v4236_v41 = vpop.f32.mrf.mxu1 }
 0x93d   : > { %v2209_v42 = vsel %vm1118_vm3, %v2208_v40, -inf  ;;  %v2973_v41 = vld [vmem:[%s5741_s19] sm:$0xff] }
 0x93e   : > { %2210 = vmax.xlane.f32.xlu0 %v2209_v42 }
 0x9c7   : > { %v2211_v44 = vpop.xlane.xlu0 %2210 }
 0x9c8   : > { %v2212_v45 = vsub.f32 %v2208_v40, %v2211_v44  ;;  %v2974_v40 = vld [vmem:[%s5741_s19 + $0x8] sm:$0xff]  ;;  %v3943_v44 = vld [vmem:[%s5740_s18] ss:$0 sm:$0xff] }
 0x9ca   : > { %v2213_v46 = vmul.f32 1.442695, %v2212_v45 }
 0x9cc   : > { %4393 = vpow2.f32 %v2213_v46 }
 0x9d9   : > { %v4394_v47 = vpop.eup %4393 }
 0x9da   : > { %v2215_v48 = vsel %vm1118_vm3, %v4394_v47, 0.0 }
 0x9db   : > { %2216 = vadd.xlane.f32.xlu1 %v2215_v48  ;;  %v2865_v48 = vstv %s3945_s25  ;;  %s3952_s25 = sld [smem:[#allocation2 + $0x5]] }
 0xa64   : > { %v2217_v49 = vpop.xlane.xlu1 %2216 }
 0xa65   : > { %4395 = vrcp.f32 %v2217_v49 }
 0xa72   : > { %v4396_v51 = vpop.eup %4395 }
 0xa73   : > { %v2219_v52 = vmul.f32 %v4396_v51, %v4394_v47 }
 0xa75   : > { %4240 = vmatmul.mubr.msk.f32.vlgmr.msra.gmra.mxu1 %vm1118_vm3, %v2219_v52 }
 0xa76   : > { %4254 = vmatpush3.msra.mxu1 %v3925_v54  ;;  %4261 = vmatprep.mubr.msk.f32.mxu1 %vm4504_vm0, %v4503_v1 }
 0xa77   : > { %4255 = vmatprep.subr.mxu1 %v4503_v1 }
 0xa78   : > { %4256 = vmatpush3.msra.mxu1 %v3924_v55 }
 0xa79   : > { %4257 = vmatprep.subr.mxu1 %v4503_v1 }
 0xa7a   : > { %4258 = vmatpush3.msra.mxu1 %v3923_v57 }
 0xa7b   : > { %4259 = vmatprep.subr.mxu1 %v4503_v1 }
 0xa7c   : > { %4260 = vmatpush3.msra.mxu1 %v3922_v58 }
 0xa7d   : > { %4262 = vmatmul.mubr.msk.f32.vlgmr.msra.gmra.mxu1 %vm804_vm1, %v4941_v30  ;;  %4275 = vmatprep.subr.mxu1 %v4503_v1  ;;  %v3934_v30 = vld [vmem:[%s5738_s16 + $0x1] ss:$0 sm:$0xff] }
 0xa7e   : > { %4277 = vmatprep.mubr.msk.f32.mxu1 %vm4504_vm0, %v4503_v1  ;;  %v2541_v19 = vadd.f32 %v3934_v30, %v2540_v18 }
 0xb35   : > { %v2289_v60 = vpop.f32.mrf.mxu1 }
 0xb37   : > { %v4241_v61 = vpop.f32.mrf.mxu1 }
 0xb3d   : > { %v2457_v0 = vpop.f32.mrf.mxu1 }
 0xb3e   : > { %v2458_v3 = vadd.f32 %v3927_v63, %v2457_v0 }
 0xb3f   : > { %v4263_v4 = vpop.f32.mrf.mxu1 }
 0xb40   : > { %4276 = vmatpush3.xpose.msk.msra.mxu1 %vm1040_vm2, %v2458_v3 }
 0xb41   : > { %4280 = vmatprep.subr.mxu1 %v4503_v1 }
 0xb43   : > { %4278 = vmatmul.mubr.msk.f32.vlgmr.msra.gmra.mxu1 %vm1040_vm2, %v2375_v6 }
 0xb44   : > { %4282 = vmatprep.mubr.msk.f32.mxu1 %vm4504_vm0, %v4503_v1  ;;  %4281 = vmatpush3.msra.mxu1 %v2541_v19 }
 0xb45   : > { %4292 = vmatprep.subr.mxu1 %v4503_v1 }
 0xc03   : > { %v2616_v11 = vpop.f32.mrf.mxu1 }
 0xc04   : > { %v2620_v43 = vmul.f32 0.25, %v2616_v11 }
 0xc05   : > { %v4279_v12 = vpop.f32.mrf.mxu1 }
 0xc06   : > { %v2621_v13 = vsel %vm1118_vm3, %v2620_v43, -inf }
 0xc07   : > { %2622 = vmax.xlane.f32.xlu0 %v2621_v13 }
 0xc90   : > { %v2623_v14 = vpop.xlane.xlu0 %2622 }
 0xc91   : > { %v2624_v15 = vsub.f32 %v2620_v43, %v2623_v14 }
 0xc93   : > { %v2625_v16 = vmul.f32 1.442695, %v2624_v15 }
 0xc95   : > { %4397 = vpow2.f32 %v2625_v16 }
 0xca2   : > { %v4398_v38 = vpop.eup %4397 }
 0xca3   : > { %v2627_v17 = vsel %vm1118_vm3, %v4398_v38, 0.0 }
 0xca4   : > { %2628 = vadd.xlane.f32.xlu1 %v2627_v17 }
 0xd2d   : > { %v2629_v22 = vpop.xlane.xlu1 %2628 }
 0xd2e   : > { %4399 = vrcp.f32 %v2629_v22 }
 0xd3b   : > { %v4400_v23 = vpop.eup %4399 }
 0xd3c   : > { %v2631_v24 = vmul.f32 %v4400_v23, %v4398_v38 }
 0xd3e   : > { %4283 = vmatmul.mubr.msk.f32.vlgmr.msra.gmra.mxu1 %vm1118_vm3, %v2631_v24 }
 0xd3f   : > { %4293 = vmatpush3.msra.mxu1 %v2294_v25  ;;  %4296 = vmatprep.mubr.msk.f32.mxu1 %vm4504_vm0, %v4503_v1 }
 0xd40   : > { %4294 = vmatprep.subr.mxu1 %v4503_v1 }
 0xd41   : > { %4295 = vmatpush3.msra.mxu1 %v2293_v26 }
 0xd42   : > { %4297 = vmatmul.mubr.msk.f32.vlgmr.msra.gmra.mxu1 %vm1040_vm2, %v2289_v60 }
 0xdfe   : > { %v2701_v28 = vpop.f32.mrf.mxu1 }
 0xdff   : > { %4290 = vmatmul.mubr.msk.f32.vlgmr.msra.gmra.mxu0 %vm1040_vm2, %v2701_v28 }
 0xe00   : > { %v4284_v29 = vpop.f32.mrf.mxu1  ;;  %3060 = vmatprep.mubr.f32.mxu0 %v4503_v1  ;;  %3021 = vmatpush1.msra.mxu0 %v2979_v34  ;;  %v2976_v1 = vld [vmem:[%s5741_s19 + $0x18] sm:$0xff] }
 0xe01   : > { %3022 = vmatprep.subr.mxu0 %v2978_v35 }
 0xe02   : > { %v2850_v31 = vpop.f32.mrf.mxu1  ;;  %3023 = vmatpush1.msra.mxu0 %v2977_v36 }
 0xe03   : > { %3024 = vmatprep.subr.mxu0 %v2976_v1 }
 0xe04   : > { %v4298_v32 = vpop.f32.mrf.mxu1  ;;  %3025 = vmatpush1.msra.mxu0 %v2975_v39 }
 0xe05   : > { %3026 = vmatprep.subr.mxu0 %v2974_v40 }
 0xe06   : > { %3027 = vmatpush1.msra.mxu0 %v2973_v41 }
 0xebf   : > { %v2777_v42 = vpop.f32.mrf.mxu0 }
 0xec0   : > { %v2851_v45 = vadd.f32 %v2850_v31, %v2777_v42 }
 0xec1   : > { %v4291_v46 = vpop.f32.mrf.mxu0 }
 0xec2   : > { %v2861_v47 = vadd.f32 %v3943_v44, %v2851_v45 }
 0xec4   : > { %v5157_v49 = vadd.f32 %v2861_v47, %v4955_v37 }
 0xec6   : > { %v5160_v51 = vadd.f32 %v2865_v48, %v5157_v49 }
 0xec8   : > { %v2870_v52 = vand.u32 2139095040, %v5160_v51  ;;  %v2867_v58 = vand.u32 2147483647, %v5160_v51  ;;  %vm2869_vm9 = vcmp.lt.s32.totalorder %v5160_v51, 0  ;;  %vm2959_vm14 = vweird.f32 %v5160_v51 }
 0xeca   : > { %v2871_v54 = vshrl.u32 %v2870_v52, 23  ;;  %v2874_v63 = vand.u32 8388607, %v2867_v58  ;;  %vm2868_vm10 = vcmp.le.f32.partialorder %v2867_v58, 0.7853982  ;;  %v2971_v58 = vstv %s3944_s6  ;;  %s3951_s6 = sld [smem:[#allocation2 + $0x4]] }
 0xecc   : > { %v3946_v55 = vadd.s32 4294967169, %v2871_v54  ;;  %v2875_v12 = vor.u32 8388608, %v2874_v63 }
 0xece   : > { %v2877_v57 = vadd.s32 1, %v3946_v55  ;;  %v2915_v24 = vshll.u32 %v2875_v12, 8 }
 0xed0   : > { %vm2878_vm0 = vcmp.gt.s32.totalorder %v2877_v57, 0 }
 0xed1   : > { %v2879_v60 = vsel %vm2878_vm0, %v2877_v57, 0 }
 0xed2   : > { %v2881_v61 = vand.u32 31, %v2879_v60  ;;  %v2880_v2 = vshrl.u32 %v2879_v60, 5 }
 0xed4   : > { %v2882_v0 = vsub.s32 32, %v2881_v61  ;;  %v2884_v37 = vshll.u32 %v4505_v5, %v2881_v61  ;;  %v2887_v3 = vshll.u32 %v4506_v50, %v2881_v61  ;;  %v2890_v7 = vshll.u32 %v4507_v53, %v2881_v61 }
 0xed5   : > { %v2893_v9 = vshll.u32 %v4508_v56, %v2881_v61  ;;  %v2896_v11 = vshll.u32 %v4509_v59, %v2881_v61  ;;  %vm2899_vm2 = vcmp.lt.s32.totalorder %v2880_v2, 1  ;;  %vm2902_vm3 = vcmp.lt.s32.totalorder %v2880_v2, 4 }
 0xed6   : > { %v2885_v4 = vshrl.u32 %v4506_v50, %v2882_v0  ;;  %v2888_v6 = vshrl.u32 %v4507_v53, %v2882_v0  ;;  %v2891_v8 = vshrl.u32 %v4508_v56, %v2882_v0  ;;  %v2894_v10 = vshrl.u32 %v4509_v59, %v2882_v0 }
 0xed7   : > { %v2897_v43 = vshrl.u32 %v4510_v62, %v2882_v0  ;;  %v2883_v19 = vshrl.u32 %v4505_v5, %v2882_v0  ;;  %vm2901_vm5 = vcmp.lt.s32.totalorder %v2880_v2, 3  ;;  %vm2900_vm6 = vcmp.lt.s32.totalorder %v2880_v2, 2 }
 0xed8   : > { %v2886_v13 = vor.u32 %v2885_v4, %v2884_v37  ;;  %v2889_v14 = vor.u32 %v2888_v6, %v2887_v3  ;;  %v2892_v15 = vor.u32 %v2891_v8, %v2890_v7  ;;  %v2895_v16 = vor.u32 %v2894_v10, %v2893_v9 }
 0xed9   : > { %v2898_v38 = vor.u32 %v2897_v43, %v2896_v11 }
 0xeda   : > { %v2904_v17 = vsel %vm2902_vm3, %v2892_v15, 2102212464  ;;  %v2907_v30 = vsel %vm2899_vm2, %v2886_v13, %v2889_v14  ;;  %v2911_v18 = vsel %vm2899_vm2, %v2889_v14, %v2892_v15  ;;  %v2908_v20 = vsel %vm2902_vm3, %v2895_v16, 920167782 }
 0xedb   : > { %v2912_v21 = vsel %vm2902_vm3, %v2898_v38, 1326507024  ;;  %v2909_v22 = vsel %vm2901_vm5, %v2892_v15, %v2908_v20  ;;  %v2903_v25 = vsel %vm2899_vm2, %v2883_v19, %v2886_v13  ;;  %v2905_v26 = vsel %vm2901_vm5, %v2889_v14, %v2904_v17 }
 0xedc   : > { %v2913_v23 = vsel %vm2901_vm5, %v2895_v16, %v2912_v21  ;;  %v2910_v27 = vsel %vm2900_vm6, %v2907_v30, %v2909_v22  ;;  %v2906_v34 = vsel %vm2900_vm6, %v2903_v25, %v2905_v26  ;;  %v3314_v21 = vld [vmem:[%s5743_s21 + $0xf8] sm:$0xff]  ;;  %v3313_v22 = vld [vmem:[%s5743_s21 + $0xf0] sm:$0xff]  ;;  %v3308_v26 = vld [vmem:[%s5743_s21 + $0xc8] sm:$0xff] }
 0xedd   : > { %v2914_v28 = vsel %vm2900_vm6, %v2911_v18, %v2913_v23  ;;  %v5180_v32 = vmul.u32.u64.low %v2915_v24, %v2910_v27  ;;  %v5181_v33 = vmul.u32.u64.high %v2915_v24, %v2910_v27, %v5180_v32  ;;  %v2922_v36 = vmul.u32 %v2915_v24, %v2906_v34  ;;  %3359 = vmatprep.subr.mxu1 %v3314_v21  ;;  %v3312_v23 = vld [vmem:[%s5743_s21 + $0xe8] sm:$0xff]  ;;  %v3309_v25 = vld [vmem:[%s5743_s21 + $0xd0] sm:$0xff]  ;;  %v3307_v27 = vld [vmem:[%s5743_s21 + $0xc0] sm:$0xff] }
 0xede   : > { %v5177_v29 = vmul.u32.u64.low %v2915_v24, %v2914_v28  ;;  %v5178_v31 = vmul.u32.u64.high %v2915_v24, %v2914_v28, %v5177_v29  ;;  %3360 = vmatpush1.msra.mxu1 %v3313_v22  ;;  %v3310_v24 = vld [vmem:[%s5743_s21 + $0xd8] sm:$0xff]  ;;  %v3301_v34 = vld [vmem:[%s5743_s21 + $0x90] sm:$0xff]  ;;  %v3320_v22 = vld [vmem:[%s5743_s21 + $0x128] sm:$0xff] }
 0xedf   : > { %v2925_v35 = vadd.s32 1, %v5181_v33  ;;  %3361 = vmatprep.subr.mxu1 %v3312_v23  ;;  %v3306_v28 = vld [vmem:[%s5743_s21 + $0xb8] sm:$0xff]  ;;  %v3305_v29 = vld [vmem:[%s5743_s21 + $0xb0] sm:$0xff]  ;;  %v3319_v23 = vld [vmem:[%s5743_s21 + $0x120] sm:$0xff] }
 0xee0   : > { %vm2924_vm7 = vc.u32 %v5178_v31, %v5180_v32  ;;  %v2923_v54 = vadd.s32 %v5180_v32, %v5178_v31  ;;  %v3304_v31 = vld [vmem:[%s5743_s21 + $0xa8] sm:$0xff]  ;;  %v3303_v32 = vld [vmem:[%s5743_s21 + $0xa0] sm:$0xff]  ;;  %v3321_v21 = vld [vmem:[%s5743_s21 + $0x130] sm:$0xff] }
 0xee1   : > { %v2926_v1 = vsel %vm2924_vm7, %v2925_v35, %v5181_v33  ;;  %v3302_v33 = vld [vmem:[%s5743_s21 + $0x98] sm:$0xff]  ;;  %v3300_v35 = vld [vmem:[%s5743_s21 + $0x88] sm:$0xff] }
 0xee2   : > { %v2927_v39 = vadd.s32 %v2926_v1, %v2922_v36  ;;  %v3299_v36 = vld [vmem:[%s5743_s21 + $0x80] sm:$0xff]  ;;  %v3298_v1 = vld [vmem:[%s5743_s21 + $0x78] sm:$0xff] }
 0xee4   : > { %v2928_v40 = vadd.s32 536870912, %v2927_v39 }
 0xee6   : > { %v2929_v41 = vshrl.u32 %v2928_v40, 30  ;;  %v3296_v40 = vld [vmem:[%s5743_s21 + $0x68] sm:$0xff] }
 0xee8   : > { %v2930_v42 = vshll.u32 %v2929_v41, 30  ;;  %v2953_v8 = vsub.s32 4, %v2929_v41 }
 0xeea   : > { %v2931_v44 = vsub.s32 %v2927_v39, %v2930_v42  ;;  %v2954_v11 = vsel %vm2869_vm9, %v2953_v8, %v2929_v41  ;;  %v3297_v39 = vld [vmem:[%s5743_s21 + $0x70] sm:$0xff]  ;;  %v3295_v41 = vld [vmem:[%s5743_s21 + $0x60] sm:$0xff]  ;;  %v3294_v42 = vld [vmem:[%s5743_s21 + $0x58] sm:$0xff] }
 0xeeb   : > { %v2956_v43 = vsel %vm2868_vm10, 0, %v2954_v11  ;;  %v3338_v8 = vld [vmem:[%s5743_s21 + $0x1b8] sm:$0xff]  ;;  %v3335_v11 = vld [vmem:[%s5743_s21 + $0x1a0] sm:$0xff] }
 0xeec   : > { %v2933_v45 = vsub.s32 0, %v2931_v44  ;;  %v2960_v12 = vadd.s32 3, %v2956_v43  ;;  %v3334_v43 = vld [vmem:[%s5743_s21 + $0x198] sm:$0xff] }
 0xeee   : > { %v3947_v46 = vmin.u32 %v2933_v45, %v2931_v44  ;;  %v2961_v13 = vand.u32 3, %v2960_v12  ;;  %v3292_v45 = vld [vmem:[%s5743_s21 + $0x48] sm:$0xff]  ;;  %v3333_v12 = vld [vmem:[%s5743_s21 + $0x190] sm:$0xff] }
 0xef0   : > { %v2935_v47 = vclz %v3947_v46  ;;  %vm2966_vm11 = vcmp.eq.s32.totalorder %v2961_v13, 2  ;;  %vm2963_vm12 = vcmp.eq.s32.totalorder %v2961_v13, 0  ;;  %vm2962_vm13 = vcmp.lt.s32.totalorder %v2961_v13, 2  ;;  %v3291_v46 = vld [vmem:[%s5743_s21 + $0x40] sm:$0xff]  ;;  %v3332_v13 = vld [vmem:[%s5743_s21 + $0x188] sm:$0xff] }
 0xef2   : > { %v3948_v48 = vadd.s32 4294967294, %v2935_v47  ;;  %v3290_v47 = vld [vmem:[%s5743_s21 + $0x38] sm:$0xff] }
 0xef4   : > { %vm3949_vm8 = vcmp.lt.s32.totalorder %v3948_v48, 0 }
 0xef5   : > { %v2938_v52 = vsel %vm3949_vm8, 0, %v3948_v48  ;;  %v3289_v48 = vld [vmem:[%s5743_s21 + $0x30] sm:$0xff] }
 0xef6   : > { %v2939_v55 = vsub.s32 32, %v2938_v52  ;;  %v2943_v57 = vsub.s32 4294967266, %v2938_v52  ;;  %v2940_v60 = vshll.u32 %v2931_v44, %v2938_v52  ;;  %v3293_v44 = vld [vmem:[%s5743_s21 + $0x50] sm:$0xff]  ;;  %v3288_v52 = vld [vmem:[%s5743_s21 + $0x28] sm:$0xff] }
 0xef8   : > { %v2941_v61 = vshrl.u32 %v2923_v54, %v2939_v55  ;;  %v2944_v63 = vadd.s32 127, %v2943_v57  ;;  %v3287_v54 = vld [vmem:[%s5743_s21 + $0x20] sm:$0xff]  ;;  %v3286_v55 = vld [vmem:[%s5743_s21 + $0x18] sm:$0xff]  ;;  %v3285_v57 = vld [vmem:[%s5743_s21 + $0x10] sm:$0xff] }
 0xefa   : > { %v2942_v0 = vor.u32 %v2941_v61, %v2940_v60  ;;  %v2945_v2 = vshll.u32 %v2944_v63, 23  ;;  %v3284_v60 = vld [vmem:[%s5743_s21 + $0x8] sm:$0xff]  ;;  %v3283_v61 = vld [vmem:[%s5743_s21] sm:$0xff]  ;;  %v3346_v63 = vld [vmem:[%s5743_s21 + $0x1f8] sm:$0xff] }
 0xefc   : > { %v2946_v37 = vor.u32 4788187, %v2945_v2  ;;  %v2949_v4 = vcvt.s32.f32 %v2942_v0  ;;  %v3345_v0 = vld [vmem:[%s5743_s21 + $0x1f0] sm:$0xff]  ;;  %v3344_v2 = vld [vmem:[%s5743_s21 + $0x1e8] sm:$0xff] }
 0xefe   : > { %v2947_v3 = vand.u32 2147483647, %v2946_v37  ;;  %v3343_v37 = vld [vmem:[%s5743_s21 + $0x1e0] sm:$0xff] }
 0xf00   : > { %v2950_v6 = vmul.f32 %v2949_v4, %v2947_v3  ;;  %v3342_v3 = vld [vmem:[%s5743_s21 + $0x1d8] sm:$0xff]  ;;  %v3341_v4 = vld [vmem:[%s5743_s21 + $0x1d0] sm:$0xff] }
 0xf02   : > { %v2951_v7 = vxor.u32 2147483648, %v2950_v6 }
 0xf04   : > { %v2952_v9 = vsel %vm2869_vm9, %v2951_v7, %v2950_v6  ;;  %v3340_v6 = vld [vmem:[%s5743_s21 + $0x1c8] sm:$0xff]  ;;  %v3339_v7 = vld [vmem:[%s5743_s21 + $0x1c0] sm:$0xff] }
 0xf05   : > { %v2955_v10 = vsel %vm2868_vm10, %v5160_v51, %v2952_v9  ;;  %v3311_v51 = vld [vmem:[%s5743_s21 + $0xe0] sm:$0xff]  ;;  %v3337_v9 = vld [vmem:[%s5743_s21 + $0x1b0] sm:$0xff] }
 0xf06   : > { %4401 = vcosq.f32 %v2955_v10  ;;  %3362 = vmatpush1.msra.mxu1 %v3311_v51  ;;  %v3318_v51 = vld [vmem:[%s5743_s21 + $0x118] sm:$0xff] }
 0xf07   : > { %4403 = vsinq.f32 %v2955_v10  ;;  %3363 = vmatprep.subr.mxu1 %v3310_v24  ;;  %v3336_v10 = vld [vmem:[%s5743_s21 + $0x1a8] sm:$0xff]  ;;  %v3317_v24 = vld [vmem:[%s5743_s21 + $0x110] sm:$0xff] }
 0xf08   : > { %3364 = vmatpush1.msra.mxu1 %v3309_v25  ;;  %v3316_v25 = vld [vmem:[%s5743_s21 + $0x108] sm:$0xff] }
 0xf09   : > { %3365 = vmatprep.subr.mxu1 %v3308_v26  ;;  %v3315_v26 = vld [vmem:[%s5743_s21 + $0x100] sm:$0xff] }
 0xf0a   : > { %3366 = vmatpush1.msra.mxu1 %v3307_v27  ;;  %v2983_v27 = vlaneseq }
 0xf0b   : > { %3367 = vmatprep.subr.mxu1 %v3306_v28 }
 0xf0c   : > { %3368 = vmatpush1.msra.mxu1 %v3305_v29  ;;  %v5385_v28 = vshrl.u32 %v2983_v27, 7 }
 0xf0d   : > { %3369 = vmatprep.subr.mxu1 %v3304_v31  ;;  %v2981_v31 = vld [vmem:[%s5742_s20] sm:$0x3] }
 0xf0e   : > { %3370 = vmatpush1.msra.mxu1 %v3303_v32  ;;  %v2985_v29 = vsub.s32 0, %v5385_v28  ;;  %v2989_v32 = vsub.s32 1, %v5385_v28 }
 0xf0f   : > { %3371 = vmatprep.subr.mxu1 %v3302_v33 }
 0xf10   : > { %3372 = vmatpush1.msra.mxu1 %v3301_v34  ;;  %v2986_v33 = vrot.slane %v2981_v31, %v2985_v29  ;;  %v2990_v34 = vrot.slane %v2981_v31, %v2989_v32 }
 0xf11   : > { %3373 = vmatprep.subr.mxu1 %v3300_v35 }
 0xf12   : > { %3374 = vmatpush1.msra.mxu1 %v3299_v36  ;;  %v3069_v36 = vstv %s3952_s25  ;;  %s780_s25 = sand.u32 1, %s4492_s2  }
 0xf13   : > { %v4402_v14 = vpop.eup %4401  ;;  %3375 = vmatprep.subr.mxu1 %v3298_v1  ;;  %s3860_s24 = sshll.u32 %s780_s25, 3  ;;  %s3758_s10 = scalar_lea.sflag [#allocation3], %s780_s25 }
 0xf14   : > { %v4404_v15 = vpop.eup %4403  ;;  %v2967_v16 = vxor.u32 2147483648, %v4402_v14  ;;  %3376 = vmatpush1.msra.mxu1 %v3297_v39  ;;  %s782_s28 = scalar_lea.vmem [#allocation5], %s3860_s24  ;;  %s4442_s24 = scalar_lea.vmem %s4441_s7, 256 }
 0xf15   : > { %v2964_v38 = vxor.u32 2147483648, %v4404_v15  ;;  %3377 = vmatprep.subr.mxu1 %v3296_v40  ;;  %s3771_s9 = sshll.u32 %s782_s28, 4  ;;  %s3772_s9 = int_to_ptr.vmem [resolvable:$true] %s3771_s9 }
 0xf16   : > { %v2968_v17 = vsel %vm2966_vm11, %v2967_v16, %v4404_v15  ;;  %3378 = vmatpush1.msra.mxu1 %v3295_v41  ;;  %v3330_v15 = vld [vmem:[%s5743_s21 + $0x178] sm:$0xff]  ;;  %v3329_v16 = vld [vmem:[%s5743_s21 + $0x170] sm:$0xff]  ;;  %s4436_s11 = scalar_lea.vmem %s3772_s9, 128  ;;  %p4443_p13 = scmp.lt.s32.totalorder %s3772_s9, %s4441_s7 }
 0xf17   : > { %v2965_v30 = vsel %vm2963_vm12, %v4402_v14, %v2964_v38  ;;  %3379 = vmatprep.subr.mxu1 %v3294_v42  ;;  %v3331_v14 = vld [vmem:[%s5743_s21 + $0x180] sm:$0xff]  ;;  %v3328_v38 = vld [vmem:[%s5743_s21 + $0x168] sm:$0xff]  ;;  %p4437_p9 = scmp.ne.s32.totalorder %s3772_s9, %s4436_s11  ;;  %p4444_p0 = scmp.lt.s32.totalorder %s4442_s24, %s4436_s11 }
 0xf18   : > { %v2969_v18 = vsel %vm2962_vm13, %v2965_v30, %v2968_v17  ;;  %3380 = vmatpush1.msra.mxu1 %v3293_v44  ;;  %v3327_v17 = vld [vmem:[%s5743_s21 + $0x160] sm:$0xff]  ;;  %v3326_v30 = vld [vmem:[%s5743_s21 + $0x158] sm:$0xff] }
 0xf19   : > { %v2970_v19 = vsel %vm2959_vm14, nan, %v2969_v18  ;;  %3381 = vmatprep.subr.mxu1 %v3292_v45  ;;  %v3324_v18 = vld [vmem:[%s5743_s21 + $0x148] sm:$0xff]  ;;  %p4438_p10 = pnand %p4437_p9, %p4680_p5  ;;  %p4445_p1 = por %p4444_p0, %p4443_p13 }
 0xf1a   : > { %v2972_v20 = vmul.f32 %v2971_v58, %v2970_v19  ;;  %3382 = vmatpush1.msra.mxu1 %v3291_v46  ;;  %v3325_v58 = vld [vmem:[%s5743_s21 + $0x150] sm:$0xff]  ;;  %v3323_v19 = vld [vmem:[%s5743_s21 + $0x140] sm:$0xff] }
 0xf1b   : > { %3383 = vmatprep.subr.mxu1 %v3290_v47  ;;  %p4439_p12 = pneg %p4438_p10 }
 0xf1c   : > { %3950 = vmatmul.mubr.msk.f32.vlgmr.msra.gmra.mxu0 %vm804_vm1, %v2972_v20  ;;  %3384 = vmatpush1.msra.mxu1 %v3289_v48  ;;  %v3322_v20 = vld [vmem:[%s5743_s21 + $0x138] sm:$0xff] }
 0xf1d   : > { %3385 = vmatprep.subr.mxu1 %v3288_v52  ;;  %p4446_p2 = pnand %p4445_p1, %p4439_p12 }
 0xf1e   : > { %3386 = vmatpush1.msra.mxu1 %v3287_v54 }
 0xf1f   : > { %3387 = vmatprep.subr.mxu1 %v3286_v55 }
 0xf20   : > { %3388 = vmatpush1.msra.mxu1 %v3285_v57 }
 0xf21   : > { %3389 = vmatprep.subr.mxu1 %v3284_v60 }
 0xf22   : > { %3390 = vmatpush1.msra.mxu1 %v3283_v61 }
 0xf23   : > { %3391 = vmatprep.subr.mxu1 %v3346_v63 }
 0xf24   : > { %3392 = vmatpush2.msra.mxu1 %v3345_v0 }
 0xf25   : > { %3393 = vmatprep.subr.mxu1 %v3344_v2 }
 0xf26   : > { %3394 = vmatpush2.msra.mxu1 %v3343_v37 }
 0xf27   : > { %3395 = vmatprep.subr.mxu1 %v3342_v3 }
 0xf28   : > { %3396 = vmatpush2.msra.mxu1 %v3341_v4 }
 0xf29   : > { %3397 = vmatprep.subr.mxu1 %v3340_v6 }
 0xf2a   : > { %3398 = vmatpush2.msra.mxu1 %v3339_v7 }
 0xf2b   : > { %3399 = vmatprep.subr.mxu1 %v3338_v8 }
 0xf2c   : > { %3400 = vmatpush2.msra.mxu1 %v3337_v9 }
 0xf2d   : > { %3401 = vmatprep.subr.mxu1 %v3336_v10 }
 0xf2e   : > { %3402 = vmatpush2.msra.mxu1 %v3335_v11 }
 0xf2f   : > { %3403 = vmatprep.subr.mxu1 %v3334_v43 }
 0xf30   : > { %3404 = vmatpush2.msra.mxu1 %v3333_v12 }
 0xf31   : > { %3405 = vmatprep.subr.mxu1 %v3332_v13 }
 0xf32   : > { %3406 = vmatpush2.msra.mxu1 %v3331_v14 }
 0xf33   : > { %3407 = vmatprep.subr.mxu1 %v3330_v15 }
 0xf34   : > { %3408 = vmatpush2.msra.mxu1 %v3329_v16 }
 0xf35   : > { %3409 = vmatprep.subr.mxu1 %v3328_v38 }
 0xf36   : > { %3410 = vmatpush2.msra.mxu1 %v3327_v17 }
 0xf37   : > { %3411 = vmatprep.subr.mxu1 %v3326_v30 }
 0xf38   : > { %3412 = vmatpush2.msra.mxu1 %v3325_v58 }
 0xf39   : > { %3413 = vmatprep.subr.mxu1 %v3324_v18 }
 0xf3a   : > { %3414 = vmatpush2.msra.mxu1 %v3323_v19 }
 0xf3b   : > { %3415 = vmatprep.subr.mxu1 %v3322_v20 }
 0xf3c   : > { %3416 = vmatpush2.msra.mxu1 %v3321_v21 }
 0xf3d   : > { %3417 = vmatprep.subr.mxu1 %v3320_v22 }
 0xf3e   : > { %3418 = vmatpush2.msra.mxu1 %v3319_v23 }
 0xf3f   : > { %3419 = vmatprep.subr.mxu1 %v3318_v51 }
 0xf40   : > { %3420 = vmatpush2.msra.mxu1 %v3317_v24 }
 0xf41   : > { %3421 = vmatprep.subr.mxu1 %v3316_v25 }
 0xf42   : > { %3422 = vmatpush2.msra.mxu1 %v3315_v26 }
 0xfdc   : > { %v3062_v35 = vpop.f32.mrf.mxu0 }
 0xfdd   : > { %v3063_v1 = vadd.f32 %v3062_v35, %v2986_v33 }
 0xfde   : > { %v3064_v39 = vpop.f32.mrf.mxu0 }
 0xfdf   : > { %v5396_v40 = vadd.f32 %v3069_v36, %v3063_v1  ;;  %v3065_v41 = vadd.f32 %v3064_v39, %v2990_v34 }
 0xfe1   : > { %v3072_v42 = vand.u32 2147483647, %v5396_v40  ;;  %v3075_v44 = vand.u32 2139095040, %v5396_v40  ;;  %v5400_v45 = vadd.f32 %v3069_v36, %v3065_v41  ;;  %vm3074_vm14 = vcmp.lt.s32.totalorder %v5396_v40, 0 }
 0xfe3   : > { %v3076_v46 = vshrl.u32 %v3075_v44, 23  ;;  %v3079_v47 = vand.u32 8388607, %v3072_v42  ;;  %v3179_v48 = vand.u32 2139095040, %v5400_v45  ;;  %v3176_v54 = vand.u32 2147483647, %v5400_v45 }
 0xfe5   : > { %v3953_v52 = vadd.s32 4294967169, %v3076_v46  ;;  %v3180_v55 = vshrl.u32 %v3179_v48, 23  ;;  %v3080_v60 = vor.u32 8388608, %v3079_v47  ;;  %v3183_v63 = vand.u32 8388607, %v3176_v54 }
 0xfe7   : > { %v3082_v57 = vadd.s32 1, %v3953_v52  ;;  %v3957_v61 = vadd.s32 4294967169, %v3180_v55  ;;  %v5408_v4 = vshll.u32 %v3080_v60, 8  ;;  %v3184_v8 = vor.u32 8388608, %v3183_v63 }
 0xfe9   : > { %vm3083_vm15 = vcmp.gt.s32.totalorder %v3082_v57, 0  ;;  %v3186_v2 = vadd.s32 1, %v3957_v61  ;;  %v3224_v35 = vshll.u32 %v3184_v8, 8 }
 0xfea   : > { %v3084_v0 = vsel %vm3083_vm15, %v3082_v57, 0  ;;  %vm5471_vm15 = vcmp.le.f32.partialorder %v3072_v42, 0.7853982 }
 0xfeb   : > { %v3085_v37 = vshrl.u32 %v3084_v0, 5  ;;  %v3086_v3 = vand.u32 31, %v3084_v0  ;;  %vm3187_vm4 = vcmp.gt.s32.totalorder %v3186_v2, 0 }
 0xfec   : > { %v3188_v18 = vsel %vm3187_vm4, %v3186_v2, 0  ;;  %vm3178_vm4 = vcmp.lt.s32.totalorder %v5400_v45, 0 }
 0xfed   : > { %v3087_v6 = vsub.s32 32, %v3086_v3  ;;  %v3089_v7 = vshll.u32 %v4505_v5, %v3086_v3  ;;  %v3092_v9 = vshll.u32 %v4506_v50, %v3086_v3  ;;  %v3095_v10 = vshll.u32 %v4507_v53, %v3086_v3 }
 0xfee   : > { %v3098_v11 = vshll.u32 %v4508_v56, %v3086_v3  ;;  %v3101_v43 = vshll.u32 %v4509_v59, %v3086_v3  ;;  %vm3104_vm0 = vcmp.lt.s32.totalorder %v3085_v37, 1  ;;  %vm3106_vm2 = vcmp.lt.s32.totalorder %v3085_v37, 3 }
 0xfef   : > { %v3090_v12 = vshrl.u32 %v4506_v50, %v3087_v6  ;;  %v3093_v13 = vshrl.u32 %v4507_v53, %v3087_v6  ;;  %v3096_v14 = vshrl.u32 %v4508_v56, %v3087_v6  ;;  %v3088_v15 = vshrl.u32 %v4505_v5, %v3087_v6 }
 0xff0   : > { %v3099_v16 = vshrl.u32 %v4509_v59, %v3087_v6  ;;  %v3102_v38 = vshrl.u32 %v4510_v62, %v3087_v6  ;;  %vm3107_vm3 = vcmp.lt.s32.totalorder %v3085_v37, 4  ;;  %v3190_v21 = vand.u32 31, %v3188_v18 }
 0xff1   : > { %v3091_v17 = vor.u32 %v3090_v12, %v3089_v7  ;;  %v3094_v30 = vor.u32 %v3093_v13, %v3092_v9  ;;  %v3097_v58 = vor.u32 %v3096_v14, %v3095_v10  ;;  %vm3105_vm5 = vcmp.lt.s32.totalorder %v3085_v37, 2 }
 0xff2   : > { %v3100_v19 = vor.u32 %v3099_v16, %v3098_v11  ;;  %v3103_v20 = vor.u32 %v3102_v38, %v3101_v43  ;;  %v3191_v31 = vsub.s32 32, %v3190_v21  ;;  %v3189_v41 = vshrl.u32 %v3188_v18, 5 }
 0xff3   : > { %v3108_v22 = vsel %vm3104_vm0, %v3088_v15, %v3091_v17  ;;  %v3109_v23 = vsel %vm3107_vm3, %v3097_v58, 2102212464  ;;  %v3112_v51 = vsel %vm3104_vm0, %v3091_v17, %v3094_v30  ;;  %v3116_v24 = vsel %vm3104_vm0, %v3094_v30, %v3097_v58 }
 0xff4   : > { %v3110_v25 = vsel %vm3106_vm2, %v3094_v30, %v3109_v23  ;;  %v3113_v26 = vsel %vm3107_vm3, %v3100_v19, 920167782  ;;  %v3117_v27 = vsel %vm3107_vm3, %v3103_v20, 1326507024  ;;  %v3193_v52 = vshll.u32 %v4505_v5, %v3190_v21 }
 0xff5   : > { %v3114_v33 = vsel %vm3106_vm2, %v3097_v58, %v3113_v26  ;;  %v3118_v34 = vsel %vm3106_vm2, %v3100_v19, %v3117_v27  ;;  %v3111_v36 = vsel %vm3105_vm5, %v3108_v22, %v3110_v25  ;;  %v3194_v55 = vshrl.u32 %v4506_v50, %v3191_v31 }
 0xff6   : > { %v3115_v1 = vsel %vm3105_vm5, %v3112_v51, %v3114_v33  ;;  %v3119_v39 = vsel %vm3105_vm5, %v3116_v24, %v3118_v34  ;;  %v3196_v57 = vshll.u32 %v4506_v50, %v3190_v21  ;;  %v3197_v60 = vshrl.u32 %v4507_v53, %v3191_v31 }
 0xff7   : > { %v5429_v44 = vmul.u32.u64.low %v5408_v4, %v3119_v39  ;;  %v5430_v46 = vmul.u32.u64.high %v5408_v4, %v3119_v39, %v5429_v44  ;;  %v5433_v47 = vmul.u32.u64.low %v5408_v4, %v3115_v1  ;;  %v5434_v48 = vmul.u32.u64.high %v5408_v4, %v3115_v1, %v5433_v47 }
 0xff8   : > { %v3199_v61 = vshll.u32 %v4507_v53, %v3190_v21  ;;  %v3200_v63 = vshrl.u32 %v4508_v56, %v3191_v31  ;;  %v3202_v0 = vshll.u32 %v4508_v56, %v3190_v21  ;;  %v3203_v2 = vshrl.u32 %v4509_v59, %v3191_v31 }
 0xff9   : > { %v3195_v37 = vor.u32 %v3194_v55, %v3193_v52  ;;  %v3198_v3 = vor.u32 %v3197_v60, %v3196_v57  ;;  %v3205_v6 = vshll.u32 %v4509_v59, %v3190_v21  ;;  %v3206_v7 = vshrl.u32 %v4510_v62, %v3191_v31 }
 0xffa   : > { %v3127_v8 = vmul.u32 %v5408_v4, %v3111_v36  ;;  %vm3129_vm6 = vc.u32 %v5430_v46, %v5433_v47  ;;  %v3130_v9 = vadd.s32 1, %v5434_v48  ;;  %v3201_v10 = vor.u32 %v3200_v63, %v3199_v61 }
 0xffb   : > { %v3192_v11 = vshrl.u32 %v4505_v5, %v3191_v31  ;;  %v3204_v43 = vor.u32 %v3203_v2, %v3202_v0  ;;  %v3207_v12 = vor.u32 %v3206_v7, %v3205_v6  ;;  %vm3208_vm7 = vcmp.lt.s32.totalorder %v3189_v41, 1 }
 0xffc   : > { %v3131_v13 = vsel %vm3129_vm6, %v3130_v9, %v5434_v48  ;;  %vm3210_vm8 = vcmp.lt.s32.totalorder %v3189_v41, 3  ;;  %vm3211_vm9 = vcmp.lt.s32.totalorder %v3189_v41, 4  ;;  %v3216_v14 = vsel %vm3208_vm7, %v3195_v37, %v3198_v3 }
 0xffd   : > { %v3132_v15 = vadd.s32 %v3131_v13, %v3127_v8  ;;  %v3213_v16 = vsel %vm3211_vm9, %v3201_v10, 2102212464  ;;  %v3217_v38 = vsel %vm3211_vm9, %v3204_v43, 920167782  ;;  %v3220_v4 = vsel %vm3208_vm7, %v3198_v3, %v3201_v10 }
 0xffe   : > { %vm3209_vm10 = vcmp.lt.s32.totalorder %v3189_v41, 2  ;;  %v3212_v17 = vsel %vm3208_vm7, %v3192_v11, %v3195_v37  ;;  %v3218_v30 = vsel %vm3210_vm8, %v3201_v10, %v3217_v38  ;;  %v3221_v58 = vsel %vm3211_vm9, %v3207_v12, 1326507024 }
 0xfff   : > { %v3133_v18 = vadd.s32 536870912, %v3132_v15  ;;  %v3214_v19 = vsel %vm3210_vm8, %v3198_v3, %v3213_v16  ;;  %v3219_v20 = vsel %vm3209_vm10, %v3216_v14, %v3218_v30  ;;  %v3222_v21 = vsel %vm3210_vm8, %v3204_v43, %v3221_v58 }
0x1000   : > { %v3223_v22 = vsel %vm3209_vm10, %v3220_v4, %v3222_v21  ;;  %v5453_v23 = vmul.u32.u64.low %v3224_v35, %v3219_v20  ;;  %v5454_v51 = vmul.u32.u64.high %v3224_v35, %v3219_v20, %v5453_v23  ;;  %v3215_v27 = vsel %vm3209_vm10, %v3212_v17, %v3214_v19 }
0x1001   : > { %v5456_v24 = vshrl.u32 %v3133_v18, 30  ;;  %v5458_v25 = vmul.u32.u64.low %v3224_v35, %v3223_v22  ;;  %v5459_v26 = vmul.u32.u64.high %v3224_v35, %v3223_v22, %v5458_v25  ;;  %v3231_v36 = vmul.u32 %v3224_v35, %v3215_v27  ;;  %v3655_v18 = vld [vmem:[%s5745_s23 + $0x48] sm:$0xff] }
0x1002   : > { %v3234_v33 = vadd.s32 1, %v5454_v51  ;;  %v3128_v0 = vadd.s32 %v5433_v47, %v5430_v46  ;;  %vm3177_vm0 = vcmp.le.f32.partialorder %v3176_v54, 0.7853982  ;;  %vm3164_vm8 = vweird.f32 %v5396_v40 }
0x1003   : > { %v3135_v31 = vshll.u32 %v5456_v24, 30  ;;  %vm3233_vm11 = vc.u32 %v5459_v26, %v5453_v23  ;;  %v3232_v38 = vadd.s32 %v5453_v23, %v5459_v26  ;;  %v3158_v26 = vsub.s32 4, %v5456_v24 }
0x1004   : > { %v3235_v1 = vsel %vm3233_vm11, %v3234_v33, %v5454_v51  ;;  %vm3268_vm10 = vweird.f32 %v5400_v45 }
0x1005   : > { %v3136_v34 = vsub.s32 %v3132_v15, %v3135_v31  ;;  %v3236_v41 = vadd.s32 %v3235_v1, %v3231_v36  ;;  %v3159_v42 = vsel %vm3074_vm14, %v3158_v26, %v5456_v24  ;;  %v3651_v26 = vld [vmem:[%s5745_s23 + $0x28] sm:$0xff] }
0x1006   : > { %v3161_v1 = vsel %vm5471_vm15, 0, %v3159_v42  ;;  %v3665_v42 = vld [vmem:[%s5745_s23 + $0x98] sm:$0xff] }
0x1007   : > { %v3138_v39 = vsub.s32 0, %v3136_v34  ;;  %v3237_v48 = vadd.s32 536870912, %v3236_v41 }
0x1009   : > { %v3954_v44 = vmin.u32 %v3138_v39, %v3136_v34  ;;  %v3238_v55 = vshrl.u32 %v3237_v48, 30 }
0x100b   : > { %v3140_v52 = vclz %v3954_v44  ;;  %v3239_v60 = vshll.u32 %v3238_v55, 30  ;;  %v3262_v33 = vsub.s32 4, %v3238_v55 }
0x100d   : > { %v3955_v57 = vadd.s32 4294967294, %v3140_v52  ;;  %v3240_v61 = vsub.s32 %v3236_v41, %v3239_v60  ;;  %v3263_v39 = vsel %vm3178_vm4, %v3262_v33, %v3238_v55  ;;  %v3165_v41 = vadd.s32 3, %v3161_v1  ;;  %v3649_v33 = vld [vmem:[%s5745_s23 + $0x18] sm:$0xff]  ;;  %v3663_v1 = vld [vmem:[%s5745_s23 + $0x88] sm:$0xff] }
0x100e   : > { %v3265_v48 = vsel %vm3177_vm0, 0, %v3263_v39  ;;  %v3647_v39 = vld [vmem:[%s5745_s23 + $0x8] sm:$0xff] }
0x100f   : > { %vm3956_vm12 = vcmp.lt.s32.totalorder %v3955_v57, 0  ;;  %v3242_v37 = vsub.s32 0, %v3240_v61  ;;  %v3269_v60 = vadd.s32 3, %v3265_v48  ;;  %v3347_v48 = vld [vmem:[%s5744_s22] sm:$0x3] }
0x1010   : > { %v3143_v63 = vsel %vm3956_vm12, 0, %v3955_v57  ;;  %v3166_v57 = vand.u32 3, %v3165_v41  ;;  %v3662_v41 = vld [vmem:[%s5745_s23 + $0x80] sm:$0xff] }
0x1011   : > { %v3144_v2 = vsub.s32 32, %v3143_v63  ;;  %v3148_v35 = vsub.s32 4294967266, %v3143_v63  ;;  %v3145_v3 = vshll.u32 %v3136_v34, %v3143_v63  ;;  %v3958_v8 = vmin.u32 %v3242_v37, %v3240_v61 }
0x1012   : > { %vm3168_vm2 = vcmp.eq.s32.totalorder %v3166_v57, 0  ;;  %vm3171_vm3 = vcmp.eq.s32.totalorder %v3166_v57, 2  ;;  %v3270_v54 = vand.u32 3, %v3269_v60  ;;  %vm3167_vm5 = vcmp.lt.s32.totalorder %v3166_v57, 2 }
0x1013   : > { %v3146_v6 = vshrl.u32 %v3128_v0, %v3144_v2  ;;  %v3149_v7 = vadd.s32 127, %v3148_v35  ;;  %v3244_v11 = vclz %v3958_v8  ;;  %v3356_v57 = vrot.slane %v3347_v48, %v2989_v32 }
0x1014   : > { %vm3275_vm6 = vcmp.eq.s32.totalorder %v3270_v54, 2  ;;  %vm3272_vm7 = vcmp.eq.s32.totalorder %v3270_v54, 0  ;;  %vm3271_vm9 = vcmp.lt.s32.totalorder %v3270_v54, 2 }
0x1015   : > { %v3147_v9 = vor.u32 %v3146_v6, %v3145_v3  ;;  %v3150_v10 = vshll.u32 %v3149_v7, 23  ;;  %v3959_v12 = vadd.s32 4294967294, %v3244_v11 }
0x1017   : > { %v3151_v43 = vor.u32 4788187, %v3150_v10  ;;  %v3154_v14 = vcvt.s32.f32 %v3147_v9  ;;  %vm3960_vm13 = vcmp.lt.s32.totalorder %v3959_v12, 0  ;;  %v3280_v10 = vstv %s3951_s6 }
0x1018   : > { %v3247_v15 = vsel %vm3960_vm13, 0, %v3959_v12 }
0x1019   : > { %v3152_v13 = vand.u32 2147483647, %v3151_v43  ;;  %v3248_v46 = vsub.s32 32, %v3247_v15  ;;  %v3252_v47 = vsub.s32 4294967266, %v3247_v15  ;;  %v3249_v17 = vshll.u32 %v3240_v61, %v3247_v15  ;;  %v3675_v15 = vld [vmem:[%s5745_s23 + $0xe8] sm:$0xff] }
0x101b   : > { %v3155_v16 = vmul.f32 %v3154_v14, %v3152_v13  ;;  %v3250_v30 = vshrl.u32 %v3232_v38, %v3248_v46  ;;  %v3253_v58 = vadd.s32 127, %v3252_v47  ;;  %v3677_v13 = vld [vmem:[%s5745_s23 + $0xf8] sm:$0xff]  ;;  %v3660_v14 = vld [vmem:[%s5745_s23 + $0x70] sm:$0xff]  ;;  %v3674_v38 = vld [vmem:[%s5745_s23 + $0xe0] sm:$0xff] }
0x101c   : > { %4064 = vmatprep.subr.mxu0 %v3677_v13  ;;  %v3658_v46 = vld [vmem:[%s5745_s23 + $0x60] sm:$0xff]  ;;  %v3673_v47 = vld [vmem:[%s5745_s23 + $0xd8] sm:$0xff] }
0x101d   : > { %v3156_v4 = vxor.u32 2147483648, %v3155_v16  ;;  %v3251_v20 = vor.u32 %v3250_v30, %v3249_v17  ;;  %v3254_v21 = vshll.u32 %v3253_v58, 23  ;;  %v3672_v17 = vld [vmem:[%s5745_s23 + $0xd0] sm:$0xff]  ;;  %v3671_v58 = vld [vmem:[%s5745_s23 + $0xc8] sm:$0xff] }
0x101e   : > { %v3656_v30 = vld [vmem:[%s5745_s23 + $0x50] sm:$0xff] }
0x101f   : > { %v3157_v19 = vsel %vm3074_vm14, %v3156_v4, %v3155_v16  ;;  %v3255_v23 = vor.u32 4788187, %v3254_v21  ;;  %v3258_v25 = vcvt.s32.f32 %v3251_v20  ;;  %v3659_v16 = vld [vmem:[%s5745_s23 + $0x68] sm:$0xff]  ;;  %v3657_v4 = vld [vmem:[%s5745_s23 + $0x58] sm:$0xff]  ;;  %v3654_v20 = vld [vmem:[%s5745_s23 + $0x40] sm:$0xff] }
0x1020   : > { %v3160_v22 = vsel %vm5471_vm15, %v5396_v40, %v3157_v19  ;;  %v3661_v40 = vld [vmem:[%s5745_s23 + $0x78] sm:$0xff]  ;;  %v3670_v19 = vld [vmem:[%s5745_s23 + $0xc0] sm:$0xff] }
0x1021   : > { %4405 = vcosq.f32 %v3160_v22  ;;  %v3256_v51 = vand.u32 2147483647, %v3255_v23  ;;  %4065 = vmatpush3.msra.mxu0 %v3661_v40  ;;  %v3669_v21 = vld [vmem:[%s5745_s23 + $0xb8] sm:$0xff]  ;;  %v3668_v23 = vld [vmem:[%s5745_s23 + $0xb0] sm:$0xff] }
0x1022   : > { %4407 = vsinq.f32 %v3160_v22  ;;  %v3653_v22 = vld [vmem:[%s5745_s23 + $0x38] sm:$0xff] }
0x1023   : > { %v3259_v27 = vmul.f32 %v3258_v25, %v3256_v51  ;;  %v3652_v51 = vld [vmem:[%s5745_s23 + $0x30] sm:$0xff]  ;;  %v3667_v25 = vld [vmem:[%s5745_s23 + $0xa8] sm:$0xff] }
0x1025   : > { %v3260_v31 = vxor.u32 2147483648, %v3259_v27 }
0x1027   : > { %v3261_v34 = vsel %vm3178_vm4, %v3260_v31, %v3259_v27  ;;  %v3666_v27 = vld [vmem:[%s5745_s23 + $0xa0] sm:$0xff] }
0x1028   : > { %v3264_v36 = vsel %vm3177_vm0, %v5400_v45, %v3261_v34  ;;  %v3676_v45 = vld [vmem:[%s5745_s23 + $0xf0] sm:$0xff]  ;;  %v3650_v31 = vld [vmem:[%s5745_s23 + $0x20] sm:$0xff] }
0x1029   : > { %4409 = vcosq.f32 %v3264_v36  ;;  %4066 = vmatprep.subr.mxu0 %v3676_v45  ;;  %v3664_v34 = vld [vmem:[%s5745_s23 + $0x90] sm:$0xff] }
0x102a   : > { %4411 = vsinq.f32 %v3264_v36  ;;  %4067 = vmatpush3.msra.mxu0 %v3660_v14  ;;  %v3648_v36 = vld [vmem:[%s5745_s23 + $0x10] sm:$0xff] }
0x102b   : > { %4068 = vmatprep.subr.mxu0 %v3675_v15 }
0x102c   : > { %4069 = vmatpush3.msra.mxu0 %v3659_v16 }
0x102d   : > { %4070 = vmatprep.subr.mxu0 %v3674_v38 }
0x102e   : > { %v4406_v44 = vpop.eup %4405  ;;  %4071 = vmatpush3.msra.mxu0 %v3658_v46 }
0x102f   : > { %v4408_v52 = vpop.eup %4407  ;;  %v3172_v61 = vxor.u32 2147483648, %v4406_v44  ;;  %4072 = vmatprep.subr.mxu0 %v3673_v47 }
0x1030   : > { %v3169_v24 = vxor.u32 2147483648, %v4408_v52  ;;  %4073 = vmatpush3.msra.mxu0 %v3657_v4 }
0x1031   : > { %v3173_v0 = vsel %vm3171_vm3, %v3172_v61, %v4408_v52  ;;  %4074 = vmatprep.subr.mxu0 %v3672_v17  ;;  %v3352_v52 = vrot.slane %v3347_v48, %v2985_v29 }
0x1032   : > { %v3170_v63 = vsel %vm3168_vm2, %v4406_v44, %v3169_v24  ;;  %4075 = vmatpush3.msra.mxu0 %v3656_v30  ;;  %v3646_v44 = vld [vmem:[%s5745_s23] sm:$0xff]  ;;  %v3432_v24 = vstv %s3962_s5 }
0x1033   : > { %v3174_v55 = vsel %vm3167_vm5, %v3170_v63, %v3173_v0  ;;  %4076 = vmatprep.subr.mxu0 %v3671_v58 }
0x1034   : > { %v3175_v8 = vsel %vm3164_vm8, nan, %v3174_v55  ;;  %4077 = vmatpush3.msra.mxu0 %v3655_v18 }
0x1035   : > { %v3281_v12 = vmul.f32 %v3280_v10, %v3175_v8  ;;  %4078 = vmatprep.subr.mxu0 %v3670_v19 }
0x1036   : > { %v4410_v2 = vpop.eup %4409  ;;  %4079 = vmatpush3.msra.mxu0 %v3654_v20 }
0x1037   : > { %v4412_v35 = vpop.eup %4411  ;;  %v3276_v37 = vxor.u32 2147483648, %v4410_v2  ;;  %4080 = vmatprep.subr.mxu0 %v3669_v21 }
0x1038   : > { %v3273_v3 = vxor.u32 2147483648, %v4412_v35  ;;  %4081 = vmatpush3.msra.mxu0 %v3653_v22 }
0x1039   : > { %v3277_v6 = vsel %vm3275_vm6, %v3276_v37, %v4412_v35  ;;  %4082 = vmatprep.subr.mxu0 %v3668_v23 }
0x103a   : > { %v3274_v7 = vsel %vm3272_vm7, %v4410_v2, %v3273_v3  ;;  %4083 = vmatpush3.msra.mxu0 %v3652_v51 }
0x103b   : > { %v3278_v9 = vsel %vm3271_vm9, %v3274_v7, %v3277_v6  ;;  %4084 = vmatprep.subr.mxu0 %v3667_v25 }
0x103c   : > { %v3279_v11 = vsel %vm3268_vm10, nan, %v3278_v9  ;;  %4085 = vmatpush3.msra.mxu0 %v3651_v26 }
0x103d   : > { %v3282_v43 = vmul.f32 %v3280_v10, %v3279_v11  ;;  %4086 = vmatprep.subr.mxu0 %v3666_v27 }
0x103e   : > { %4087 = vmatpush3.msra.mxu0 %v3650_v31 }
0x103f   : > { %3423 = vmatprep.mubr.f32.mxu1 %v3282_v43  ;;  %4088 = vmatprep.subr.mxu0 %v3665_v42 }
0x1040   : > { %3424 = vmatmul.mubr.f32.vlgmr.msra.gmra.mxu1 %v3281_v12  ;;  %4089 = vmatpush3.msra.mxu0 %v3649_v33 }
0x1041   : > { %4090 = vmatprep.subr.mxu0 %v3664_v34 }
0x1042   : > { %4091 = vmatpush3.msra.mxu0 %v3648_v36 }
0x1043   : > { %4092 = vmatprep.subr.mxu0 %v3663_v1 }
0x1044   : > { %4093 = vmatpush3.msra.mxu0 %v3647_v39 }
0x1045   : > { %4094 = vmatprep.subr.mxu0 %v3662_v41 }
0x1046   : > { %4095 = vmatpush3.msra.mxu0 %v3646_v44 }
0x1100   : > { %v3425_v60 = vpop.f32.mrf.mxu1 }
0x1101   : > { %v3426_v61 = vadd.f32 %v3425_v60, %v3352_v52 }
0x1102   : > { %v3427_v54 = vpop.f32.mrf.mxu1 }
0x1103   : > { %v5591_v63 = vadd.f32 %v3432_v24, %v3426_v61  ;;  %v3428_v0 = vadd.f32 %v3427_v54, %v3356_v57 }
0x1105   : > { %v3435_v2 = vand.u32 2147483647, %v5591_v63  ;;  %v3438_v35 = vand.u32 2139095040, %v5591_v63  ;;  %v5595_v37 = vadd.f32 %v3432_v24, %v3428_v0  ;;  %vm3437_vm10 = vcmp.lt.s32.totalorder %v5591_v63, 0 }
0x1107   : > { %v3439_v55 = vshrl.u32 %v3438_v35, 23  ;;  %v3442_v29 = vand.u32 8388607, %v3435_v2  ;;  %v3542_v28 = vand.u32 2139095040, %v5595_v37  ;;  %v3539_v3 = vand.u32 2147483647, %v5595_v37 }
0x1109   : > { %v3963_v32 = vadd.s32 4294967169, %v3439_v55  ;;  %v3543_v6 = vshrl.u32 %v3542_v28, 23  ;;  %v3443_v8 = vor.u32 8388608, %v3442_v29  ;;  %v3546_v10 = vand.u32 8388607, %v3539_v3 }
0x110b   : > { %v3445_v7 = vadd.s32 1, %v3963_v32  ;;  %v3967_v9 = vadd.s32 4294967169, %v3543_v6  ;;  %v5603_v40 = vshll.u32 %v3443_v8, 8  ;;  %v3547_v15 = vor.u32 8388608, %v3546_v10 }
0x110d   : > { %vm3446_vm11 = vcmp.gt.s32.totalorder %v3445_v7, 0  ;;  %v3549_v43 = vadd.s32 1, %v3967_v9  ;;  %v3587_v48 = vshll.u32 %v3547_v15, 8 }
0x110e   : > { %v3447_v11 = vsel %vm3446_vm11, %v3445_v7, 0  ;;  %vm5666_vm11 = vcmp.le.f32.partialorder %v3435_v2, 0.7853982 }
0x110f   : > { %v3448_v12 = vshrl.u32 %v3447_v11, 5  ;;  %v3449_v13 = vand.u32 31, %v3447_v11  ;;  %vm3550_vm12 = vcmp.gt.s32.totalorder %v3549_v43, 0 }
0x1110   : > { %v3551_v23 = vsel %vm3550_vm12, %v3549_v43, 0  ;;  %vm3541_vm12 = vcmp.lt.s32.totalorder %v5595_v37, 0 }
0x1111   : > { %v3450_v45 = vsub.s32 32, %v3449_v13  ;;  %v3452_v14 = vshll.u32 %v4505_v5, %v3449_v13  ;;  %v3455_v16 = vshll.u32 %v4506_v50, %v3449_v13  ;;  %v3458_v38 = vshll.u32 %v4507_v53, %v3449_v13 }
0x1112   : > { %v3461_v46 = vshll.u32 %v4508_v56, %v3449_v13  ;;  %v3464_v47 = vshll.u32 %v4509_v59, %v3449_v13  ;;  %vm3467_vm13 = vcmp.lt.s32.totalorder %v3448_v12, 1  ;;  %vm3469_vm14 = vcmp.lt.s32.totalorder %v3448_v12, 3 }
0x1113   : > { %v3453_v4 = vshrl.u32 %v4506_v50, %v3450_v45  ;;  %v3456_v17 = vshrl.u32 %v4507_v53, %v3450_v45  ;;  %v3459_v30 = vshrl.u32 %v4508_v56, %v3450_v45  ;;  %v3451_v58 = vshrl.u32 %v4505_v5, %v3450_v45 }
0x1114   : > { %v3462_v18 = vshrl.u32 %v4509_v59, %v3450_v45  ;;  %v3465_v19 = vshrl.u32 %v4510_v62, %v3450_v45  ;;  %vm3470_vm15 = vcmp.lt.s32.totalorder %v3448_v12, 4  ;;  %v3553_v26 = vand.u32 31, %v3551_v23 }
0x1115   : > { %v3454_v20 = vor.u32 %v3453_v4, %v3452_v14  ;;  %v3457_v21 = vor.u32 %v3456_v17, %v3455_v16  ;;  %v3460_v22 = vor.u32 %v3459_v30, %v3458_v38  ;;  %vm3468_vm4 = vcmp.lt.s32.totalorder %v3448_v12, 2 }
0x1116   : > { %v3463_v51 = vor.u32 %v3462_v18, %v3461_v46  ;;  %v3466_v25 = vor.u32 %v3465_v19, %v3464_v47  ;;  %v3554_v39 = vsub.s32 32, %v3553_v26  ;;  %v3552_v24 = vshrl.u32 %v3551_v23, 5 }
0x1117   : > { %v3471_v27 = vsel %vm3467_vm13, %v3451_v58, %v3454_v20  ;;  %v3472_v31 = vsel %vm3470_vm15, %v3460_v22, 2102212464  ;;  %v3475_v42 = vsel %vm3467_vm13, %v3454_v20, %v3457_v21  ;;  %v3479_v33 = vsel %vm3467_vm13, %v3457_v21, %v3460_v22 }
0x1118   : > { %v3473_v34 = vsel %vm3469_vm14, %v3457_v21, %v3472_v31  ;;  %v3476_v36 = vsel %vm3470_vm15, %v3463_v51, 920167782  ;;  %v3480_v1 = vsel %vm3470_vm15, %v3466_v25, 1326507024  ;;  %v3556_v55 = vshll.u32 %v4505_v5, %v3553_v26 }
0x1119   : > { %v3477_v41 = vsel %vm3469_vm14, %v3460_v22, %v3476_v36  ;;  %v3481_v44 = vsel %vm3469_vm14, %v3463_v51, %v3480_v1  ;;  %v3474_v52 = vsel %vm3468_vm4, %v3471_v27, %v3473_v34  ;;  %v3557_v29 = vshrl.u32 %v4506_v50, %v3554_v39 }
0x111a   : > { %v3478_v57 = vsel %vm3468_vm4, %v3475_v42, %v3477_v41  ;;  %v3482_v60 = vsel %vm3468_vm4, %v3479_v33, %v3481_v44  ;;  %v3559_v28 = vshll.u32 %v4506_v50, %v3553_v26  ;;  %v3560_v32 = vshrl.u32 %v4507_v53, %v3554_v39 }
0x111b   : > { %v5624_v61 = vmul.u32.u64.low %v5603_v40, %v3482_v60  ;;  %v5625_v54 = vmul.u32.u64.high %v5603_v40, %v3482_v60, %v5624_v61  ;;  %v5628_v0 = vmul.u32.u64.low %v5603_v40, %v3478_v57  ;;  %v5629_v35 = vmul.u32.u64.high %v5603_v40, %v3478_v57, %v5628_v0 }
0x111c   : > { %v3562_v6 = vshll.u32 %v4507_v53, %v3553_v26  ;;  %v3563_v7 = vshrl.u32 %v4508_v56, %v3554_v39  ;;  %v3565_v8 = vshll.u32 %v4508_v56, %v3553_v26  ;;  %v3566_v9 = vshrl.u32 %v4509_v59, %v3554_v39 }
0x111d   : > { %v3558_v10 = vor.u32 %v3557_v29, %v3556_v55  ;;  %v3561_v11 = vor.u32 %v3560_v32, %v3559_v28  ;;  %v3568_v43 = vshll.u32 %v4509_v59, %v3553_v26  ;;  %v3569_v12 = vshrl.u32 %v4510_v62, %v3554_v39 }
0x111e   : > { %v3490_v13 = vmul.u32 %v5603_v40, %v3474_v52  ;;  %vm3492_vm0 = vc.u32 %v5625_v54, %v5628_v0  ;;  %v3493_v50 = vadd.s32 1, %v5629_v35  ;;  %v3564_v53 = vor.u32 %v3563_v7, %v3562_v6 }
0x111f   : > { %v3555_v45 = vshrl.u32 %v4505_v5, %v3554_v39  ;;  %v3567_v14 = vor.u32 %v3566_v9, %v3565_v8  ;;  %v3570_v56 = vor.u32 %v3569_v12, %v3568_v43  ;;  %vm3571_vm2 = vcmp.lt.s32.totalorder %v3552_v24, 1 }
0x1120   : > { %v3494_v15 = vsel %vm3492_vm0, %v3493_v50, %v5629_v35  ;;  %vm3573_vm3 = vcmp.lt.s32.totalorder %v3552_v24, 3  ;;  %vm3574_vm5 = vcmp.lt.s32.totalorder %v3552_v24, 4  ;;  %v3579_v59 = vsel %vm3571_vm2, %v3558_v10, %v3561_v11 }
0x1121   : > { %v3495_v16 = vadd.s32 %v3494_v15, %v3490_v13  ;;  %v3576_v62 = vsel %vm3574_vm5, %v3564_v53, 2102212464  ;;  %v3580_v38 = vsel %vm3574_vm5, %v3567_v14, 920167782  ;;  %v3583_v40 = vsel %vm3571_vm2, %v3561_v11, %v3564_v53 }
0x1122   : > { %vm3572_vm6 = vcmp.lt.s32.totalorder %v3552_v24, 2  ;;  %v3575_v46 = vsel %vm3571_vm2, %v3555_v45, %v3558_v10  ;;  %v3581_v47 = vsel %vm3573_vm3, %v3564_v53, %v3580_v38  ;;  %v3584_v4 = vsel %vm3574_vm5, %v3570_v56, 1326507024 }
0x1123   : > { %v3496_v17 = vadd.s32 536870912, %v3495_v16  ;;  %v3577_v30 = vsel %vm3573_vm3, %v3561_v11, %v3576_v62  ;;  %v3582_v58 = vsel %vm3572_vm6, %v3579_v59, %v3581_v47  ;;  %v3585_v5 = vsel %vm3573_vm3, %v3567_v14, %v3584_v4 }
0x1124   : > { %v3586_v18 = vsel %vm3572_vm6, %v3583_v40, %v3585_v5  ;;  %v5648_v19 = vmul.u32.u64.low %v3587_v48, %v3582_v58  ;;  %v5649_v20 = vmul.u32.u64.high %v3587_v48, %v3582_v58, %v5648_v19  ;;  %v3578_v51 = vsel %vm3572_vm6, %v3575_v46, %v3577_v30 }
0x1125   : > { %v5651_v21 = vshrl.u32 %v3496_v17, 30  ;;  %v5653_v22 = vmul.u32.u64.low %v3587_v48, %v3586_v18  ;;  %v5654_v23 = vmul.u32.u64.high %v3587_v48, %v3586_v18, %v5653_v22  ;;  %v3594_v31 = vmul.u32 %v3587_v48, %v3578_v51 }
0x1126   : > { %v3597_v26 = vadd.s32 1, %v5649_v20  ;;  %v3491_v24 = vadd.s32 %v5628_v0, %v5625_v54  ;;  %vm3540_vm13 = vcmp.le.f32.partialorder %v3539_v3, 0.7853982  ;;  %vm3527_vm3 = vweird.f32 %v5591_v63 }
0x1127   : > { %v3498_v25 = vshll.u32 %v5651_v21, 30  ;;  %vm3596_vm7 = vc.u32 %v5654_v23, %v5648_v19  ;;  %v3595_v50 = vadd.s32 %v5648_v19, %v5654_v23  ;;  %v3521_v4 = vsub.s32 4, %v5651_v21 }
0x1128   : > { %v3598_v42 = vsel %vm3596_vm7, %v3597_v26, %v5649_v20  ;;  %vm3631_vm6 = vweird.f32 %v5595_v37 }
0x1129   : > { %v3499_v27 = vsub.s32 %v3495_v16, %v3498_v25  ;;  %v3599_v34 = vadd.s32 %v3598_v42, %v3594_v31  ;;  %v3522_v2 = vsel %vm3437_vm10, %v3521_v4, %v5651_v21 }
0x112a   : > { %v3524_v19 = vsel %vm5666_vm11, 0, %v3522_v2 }
0x112b   : > { %v3501_v33 = vsub.s32 0, %v3499_v27  ;;  %v3600_v1 = vadd.s32 536870912, %v3599_v34  ;;  %v3528_v22 = vadd.s32 3, %v3524_v19 }
0x112d   : > { %v3964_v36 = vmin.u32 %v3501_v33, %v3499_v27  ;;  %v3601_v41 = vshrl.u32 %v3600_v1, 30  ;;  %v3529_v26 = vand.u32 3, %v3528_v22 }
0x112f   : > { %v3503_v39 = vclz %v3964_v36  ;;  %v3602_v52 = vshll.u32 %v3601_v41, 30  ;;  %v3625_v58 = vsub.s32 4, %v3601_v41  ;;  %vm3531_vm14 = vcmp.eq.s32.totalorder %v3529_v26, 0 }
0x1130   : > { %vm3534_vm15 = vcmp.eq.s32.totalorder %v3529_v26, 2  ;;  %vm3530_vm4 = vcmp.lt.s32.totalorder %v3529_v26, 2 }
0x1131   : > { %v3965_v44 = vadd.s32 4294967294, %v3503_v39  ;;  %v3603_v57 = vsub.s32 %v3599_v34, %v3602_v52  ;;  %v3626_v20 = vsel %vm3541_vm12, %v3625_v58, %v3601_v41 }
0x1132   : > { %v3628_v51 = vsel %vm3540_vm13, 0, %v3626_v20 }
0x1133   : > { %vm3966_vm8 = vcmp.lt.s32.totalorder %v3965_v44, 0  ;;  %v3605_v35 = vsub.s32 0, %v3603_v57 }
0x1134   : > { %v3506_v60 = vsel %vm3966_vm8, 0, %v3965_v44 }
0x1135   : > { %v3507_v61 = vsub.s32 32, %v3506_v60  ;;  %v3511_v48 = vsub.s32 4294967266, %v3506_v60  ;;  %v3508_v55 = vshll.u32 %v3499_v27, %v3506_v60  ;;  %v3968_v32 = vmin.u32 %v3605_v35, %v3603_v57 }
0x1136   : > { %v3632_v27 = vadd.s32 3, %v3628_v51 }
0x1137   : > { %v3509_v29 = vshrl.u32 %v3491_v24, %v3507_v61  ;;  %v3512_v28 = vadd.s32 127, %v3511_v48  ;;  %v3607_v8 = vclz %v3968_v32  ;;  %v3643_v24 = vstv %s3961_s1  ;;  %s3769_s1 = scalar_lea.hbm %s5812_s8, %s3973_s3 }
0x1138   : > { %v3633_v3 = vand.u32 3, %v3632_v27 }
0x1139   : > { %v3510_v6 = vor.u32 %v3509_v29, %v3508_v55  ;;  %v3513_v7 = vshll.u32 %v3512_v28, 23  ;;  %v3969_v10 = vadd.s32 4294967294, %v3607_v8 }
0x113a   : > { %vm3638_vm0 = vcmp.eq.s32.totalorder %v3633_v3, 2  ;;  %vm3635_vm2 = vcmp.eq.s32.totalorder %v3633_v3, 0  ;;  %vm3634_vm5 = vcmp.lt.s32.totalorder %v3633_v3, 2 }
0x113b   : > { %v3514_v9 = vor.u32 4788187, %v3513_v7  ;;  %v3517_v43 = vcvt.s32.f32 %v3510_v6  ;;  %vm3970_vm9 = vcmp.lt.s32.totalorder %v3969_v10, 0 }
0x113c   : > { %v3610_v12 = vsel %vm3970_vm9, 0, %v3969_v10 }
0x113d   : > { %v3515_v11 = vand.u32 2147483647, %v3514_v9  ;;  %v3611_v54 = vsub.s32 32, %v3610_v12  ;;  %v3615_v0 = vsub.s32 4294967266, %v3610_v12  ;;  %v3612_v45 = vshll.u32 %v3603_v57, %v3610_v12 }
0x113f   : > { %v3518_v13 = vmul.f32 %v3517_v43, %v3515_v11  ;;  %v3613_v14 = vshrl.u32 %v3595_v50, %v3611_v54  ;;  %v3616_v56 = vadd.s32 127, %v3615_v0 }
0x1141   : > { %v3519_v53 = vxor.u32 2147483648, %v3518_v13  ;;  %v3614_v16 = vor.u32 %v3613_v14, %v3612_v45  ;;  %v3617_v62 = vshll.u32 %v3616_v56, 23 }
0x1143   : > { %v3520_v59 = vsel %vm3437_vm10, %v3519_v53, %v3518_v13  ;;  %v3618_v40 = vor.u32 4788187, %v3617_v62  ;;  %v3621_v47 = vcvt.s32.f32 %v3614_v16 }
0x1144   : > { %v3523_v38 = vsel %vm5666_vm11, %v5591_v63, %v3520_v59  ;;  %v3971_v63 = vld [vmem:[%s5811_s30] ss:$0 sm:$0xff] }
0x1145   : > { %4413 = vcosq.f32 %v3523_v38  ;;  %v3619_v46 = vand.u32 2147483647, %v3618_v40 }
0x1146   : > { %4415 = vsinq.f32 %v3523_v38 }
0x1147   : > { %v3622_v17 = vmul.f32 %v3621_v47, %v3619_v46 }
0x1149   : > { %v3623_v30 = vxor.u32 2147483648, %v3622_v17 }
0x114b   : > { %v3624_v5 = vsel %vm3541_vm12, %v3623_v30, %v3622_v17 }
0x114c   : > { %v3627_v18 = vsel %vm3540_vm13, %v5595_v37, %v3624_v5 }
0x114d   : > { %4417 = vcosq.f32 %v3627_v18 }
0x114e   : > { %4419 = vsinq.f32 %v3627_v18 }
0x1152   : > { %v4414_v23 = vpop.eup %4413 }
0x1153   : > { %v4416_v25 = vpop.eup %4415  ;;  %v3535_v31 = vxor.u32 2147483648, %v4414_v23 }
0x1154   : > { %v3532_v21 = vxor.u32 2147483648, %v4416_v25 }
0x1155   : > { %v3536_v33 = vsel %vm3534_vm15, %v3535_v31, %v4416_v25 }
0x1156   : > { %v3533_v42 = vsel %vm3531_vm14, %v4414_v23, %v3532_v21 }
0x1157   : > { %v3537_v39 = vsel %vm3530_vm4, %v3533_v42, %v3536_v33 }
0x1158   : > { %v3538_v57 = vsel %vm3527_vm3, nan, %v3537_v39 }
0x1159   : > { %v3644_v35 = vmul.f32 %v3643_v24, %v3538_v57 }
0x115a   : > { %v4418_v34 = vpop.eup %4417 }
0x115b   : > { %v4420_v36 = vpop.eup %4419  ;;  %v3639_v1 = vxor.u32 2147483648, %v4418_v34 }
0x115c   : > { %v3636_v41 = vxor.u32 2147483648, %v4420_v36 }
0x115d   : > { %v3640_v44 = vsel %vm3638_vm0, %v3639_v1, %v4420_v36 }
0x115e   : > { %v3637_v52 = vsel %vm3635_vm2, %v4418_v34, %v3636_v41 }
0x115f   : > { %v3641_v60 = vsel %vm3634_vm5, %v3637_v52, %v3640_v44 }
0x1160   : > { %v3642_v61 = vsel %vm3631_vm6, nan, %v3641_v60 }
0x1161   : > { %v3645_v48 = vmul.f32 %v3643_v24, %v3642_v61 }
0x1163   : > { %3749 = vmatprep.mubr.f32.mxu0 %v3645_v48 }
0x1164   : > { %3750 = vmatmul.mubr.f32.vlgmr.msra.gmra.mxu0 %v3644_v35 }
0x1224   : > { %v4096_v55 = vpop.f32.mrf.mxu0 }
0x1226   : > { %v4097_v29 = vpop.f32.mrf.mxu0 }
0x1227   : > { %v4098_v28 = vadd.f32 %v4097_v29, %v4096_v55 }
0x1229   : > { %v3752_v37 = vadd.f32 %v4098_v28, %v3971_v63 }
0x122b   : > { %v3755_v32 = vadd.f32 %v3752_v37, %v5157_v49 }
0x122d   : > { %3756 = vst.msk [vmem:[%s782_s28] sm:$0xff] %vm804_vm1, %v3755_v32 }
0x122e   : > { %4449 = shalt.err (!%p4446_p2)
}
0x122f   : > { %s4450_s6 = scalar_lea.hbm %s3769_s1, 128  ;;  %s4454_s3 = scalar_lea.hbm %s5812_s8, 256 }
0x1230   : > { %p4451_p3 = scmp.ne.s32.totalorder %s3769_s1, %s4450_s6  ;;  %p4455_p8 = scmp.lt.s32.totalorder %s3769_s1, %s5812_s8 }
0x1231   : > { %p4456_p11 = scmp.lt.s32.totalorder %s4454_s3, %s4450_s6 }
0x1232   : > { %p4452_p4 = pnand %p4451_p3, %p4680_p5 }
0x1233   : > { %p4457_p9 = por %p4456_p11, %p4455_p8 }
0x1234   : > { %p4453_p7 = pneg %p4452_p4 }
0x1236   : > { %p4458_p10 = pnand %p4457_p9, %p4453_p7 }
0x1238   : > { %4461 = shalt.err (!%p4458_p10)
}
0x1239   : > { %4327 = dma.vmem_to_hbm [thread:$0]  (%p4680_p5), %s3772_s9, 128, %s3769_s1, %s3758_s10  }
0x123a PF: > { %s5813_s11 = sld [smem:[#allocation10_spill]] }
0x123b   : > { %s5814_s0 = sld [smem:[#allocation8_spill]] }
0x1240   : > { %p4339_p12 = scmp.ge.s32.totalorder %s5813_s11, 2 }
0x1241   : > { %s3783_s7 = sand.u32 1, %s5814_s0  }
0x1242   : > { %p4334_p13 = pnand %p4339_p12, %p4684_p6  ;;  %s3784_s24 = scalar_lea.sflag [#allocation3], %s3783_s7 }
0x1244   : > { %p4335_p0 = pneg %p4334_p13 }
0x1246   : > { %4483 = dma.done.wait (%p4335_p0), %s3784_s24, 128  }
0x1247   : > { %4485 = vsyncadd (%p4335_p0), %s3784_s24, 4294967168  ;;  %s5816_s30 = sld [smem:[#allocation11_spill]]  ;;  %s5819_s29 = smov %s4492_s2 }
0x1248   : > { %s5817_s6 = sld [smem:[#allocation9_spill]] }
0x1249   : > { %s5818_s25 = sld [smem:[#allocation12_spill]] }
0x124d   : > { %p36_p1 = scmp.ge.s32.totalorder %s5816_s30, 4  }
0x124e   : > { %s5820_s2 = smov %s5817_s6 }
0x124f   : > { %s5821_s6 = smov %s5818_s25  ;;  %38 = sbr.rel (!%p36_p1) target bundleno = 19 (0x13), region = 177 }
0x1254   :  { %3789 = vsyncpa [#allocation3], 1 }
0x1255   :  { %3791 = vsyncpa [#allocation3 + $0x1], 1 }
0x1256   :  { %3792 = vsyncpa [#allocation4], 1 }
0x1257   :  { %3794 = vsyncpa [#allocation4 + $0x1], 1 }

</bundles_post_ra>
